<compile_context>
chip_gen: v6e
topology: v6e:2x2x1
jax: 0.10.0
libtpu: 0.0.40
codegen_flags: <defaults>
</compile_context>

<pallas_src>
import functools

import jax
import jax.numpy as jnp
from jax.experimental import pallas as pl
from jax.experimental.pallas import tpu as pltpu


# --------------------------------------------------------------------------
# One-time hardware self-check of pltpu.roll's rotation direction.
# (Documented/tested semantics match jnp.roll; this probe makes the tap-shift
#  sign robust either way.  Must be primed outside jit -- done in __main__.)
# --------------------------------------------------------------------------
_ROLL_LIKE_JNP = None


def _roll_matches_jnp():
    global _ROLL_LIKE_JNP
    if _ROLL_LIKE_JNP is None:
        try:
            def k(x_ref, o_ref):
                o_ref[...] = pltpu.roll(x_ref[...], 1, axis=1)

            x = jnp.broadcast_to(jnp.arange(256, dtype=jnp.float32), (8, 256))
            y = pl.pallas_call(
                k, out_shape=jax.ShapeDtypeStruct((8, 256), jnp.float32))(x)
            _ROLL_LIKE_JNP = bool(y[0, 0] == x[0, 255])  # jnp.roll(x,1)[0]==x[-1]
        except Exception:
            return True  # called under a trace / probe unavailable: assume jnp
    return _ROLL_LIKE_JNP


# --------------------------------------------------------------------------
# In-kernel fused 3x3 "same" conv: ONE matmul on a (9*Cin, HW) rolled slab.
# --------------------------------------------------------------------------
def _conv3x3_fused(x, w_fused, bias, mask_ref, shifts):
    """3x3 conv on a channels-first (Cin, HW) slab as a single MXU matmul.

    shifts[t] rolls the flattened spatial axis so element s of piece t is
    x[:, s + dy*W + dx]; mask_ref[t] zeroes positions whose source pixel falls
    outside the HxW image (H-edge and W-edge wraparound of the roll)."""
    pieces = []
    for t, sh in enumerate(shifts):
        if t == 4:                                   # center tap: no shift/mask
            pieces.append(x)
        else:
            pieces.append(pltpu.roll(x, sh, axis=1) * mask_ref[t])
    slab = jnp.concatenate(pieces, axis=0).astype(jnp.bfloat16)   # (9*Cin, HW)
    return jnp.dot(w_fused, slab, preferred_element_type=jnp.float32) + bias


def _head_softmax(parts):
    """exp(x - max) over the per-head slab list + shared approx reciprocal."""
    m = parts[0]
    for p in parts[1:]:
        m = jnp.maximum(m, p)
    ex = [jnp.exp(p - m) for p in parts]
    tot = ex[0]
    for e in ex[1:]:
        tot = tot + e
    return ex, pl.reciprocal(tot, approx=True)


# --------------------------------------------------------------------------
# Fused kernel: QKV conv -> linear attention -> projection conv -> GroupNorm.
# One grid step handles `nb` samples; everything stays in VMEM.
# --------------------------------------------------------------------------
def _fused_attention_kernel(x_ref, wqkv_ref, bqkv_ref, wp_ref, bp_ref,
                            gamma_ref, beta_ref, mask_ref, o_ref,
                            *, num_heads, embed_dim, shifts):
    hidden = num_heads * embed_dim
    nb = x_ref.shape[0]

    wqkv = wqkv_ref[...]          # (3*hidden, 9*Cin)  bf16
    bqkv = bqkv_ref[...]          # (3*hidden, 1)      f32
    wp = wp_ref[...]              # (Cin, 9*hidden)    bf16
    bp = bp_ref[...]              # (Cin, 1)           f32
    gamma = gamma_ref[...]        # (Cin, 1)
    beta = beta_ref[...]          # (Cin, 1)

    for s in range(nb):           # static, unrolled (nb is small)
        x = x_ref[s]              # (Cin, HW) f32

        # ---- fused Q/K/V 3x3 convs: one matmul -> (3*hidden, HW) ----------
        qkv = _conv3x3_fused(x, wqkv, bqkv, mask_ref, shifts)

        def head(which, h):                       # which: 0=Q, 1=K, 2=V
            base = which * hidden + h * embed_dim
            return qkv[base:base + embed_dim, :]  # (emb, HW)

        # ---- phase A: K softmax (over head axis) + all KV reductions ------
        k_exp, k_inv = _head_softmax([head(1, h) for h in range(num_heads)])
        k_sm = [e * k_inv for e in k_exp]
        v_h = [head(2, h) for h in range(num_heads)]
        kv = [[jnp.sum(v_h[h1] * k_sm[h2], axis=1, keepdims=True)   # (emb, 1)
               for h2 in range(num_heads)] for h1 in range(num_heads)]

        # ---- phase B: un-normalized exp(Q); shared 1/sum applied per head -
        q_exp, q_inv = _head_softmax([head(0, h) for h in range(num_heads)])
        y_parts = []
        for h1 in range(num_heads):
            acc = kv[h1][0] * q_exp[0]
            for h2 in range(1, num_heads):
                acc = acc + kv[h1][h2] * q_exp[h2]
            y_parts.append(acc * q_inv)
        # torch.cat channel order: c = h1*embed_dim + e
        y = jnp.concatenate(y_parts, axis=0)                        # (hidden, HW)

        # ---- projection 3x3 conv (one matmul) + GroupNorm(1, C) -----------
        out = _conv3x3_fused(y, wp, bp, mask_ref, shifts)           # (Cin, HW)
        mu = jnp.mean(out)
        var = jnp.mean((out - mu) * (out - mu))                     # biased (torch)
        inv = jax.lax.rsqrt(var + 1e-5)
        o_ref[s] = ((out - mu) * inv * gamma + beta).astype(o_ref.dtype)


# --------------------------------------------------------------------------
# Full forward matching Attention.forward with linear_attn=True.
# Takes / returns NCHW float32 (PyTorch convention), params in PyTorch layout.
# --------------------------------------------------------------------------
def attention_forward(x_nchw, params, *, num_heads, embed_dim,
                      samples_per_block=1):
    N, C, H, W = x_nchw.shape
    HW = H * W
    hidden = num_heads * embed_dim
    nb = samples_per_block
    assert N % nb == 0, (N, nb)
    n_blocks = N // nb

    x_flat = x_nchw.reshape(N, C, HW)       # channels-first, no pad / transpose

    # ---- tap-fused weights (Cout, 9*Cin), bf16 for the MXU; rest stays f32 --
    def fuse(w_oihw):                        # (Cout,Cin,3,3) -> (Cout, 9*Cin)
        co, ci = w_oihw.shape[0], w_oihw.shape[1]
        return jnp.transpose(w_oihw, (0, 2, 3, 1)).reshape(co, 9 * ci)

    wqkv = jnp.concatenate(
        [fuse(params["wq"]), fuse(params["wk"]), fuse(params["wv"])],
        axis=0).astype(jnp.bfloat16)                        # (3*hidden, 9*C)
    bqkv = jnp.concatenate(
        [params["bq"], params["bk"], params["bv"]]).reshape(3 * hidden, 1)
    wp = fuse(params["wp"]).astype(jnp.bfloat16)            # (C, 9*hidden)
    bp = params["bp"].reshape(C, 1)
    gamma = params["gamma"].reshape(C, 1)
    beta = params["beta"].reshape(C, 1)

    # ---- per-tap boundary masks + roll amounts (static) ---------------------
    col = jnp.arange(HW, dtype=jnp.int32) % W
    row = jnp.arange(HW, dtype=jnp.int32) // W
    roll_like_jnp = _roll_matches_jnp()
    masks, shifts = [], []
    for ky in range(3):
        for kx in range(3):
            keep = jnp.ones((HW,), dtype=jnp.bool_)
            if kx == 0:
                keep &= (col >= 1)
            if kx == 2:
                keep &= (col <= W - 2)
            if ky == 0:
                keep &= (row >= 1)
            if ky == 2:
                keep &= (row <= H - 2)
            masks.append(keep.astype(jnp.float32))
            d = (ky - 1) * W + (kx - 1)      # want piece[s] = x[s + d]
            shifts.append(int((-d if roll_like_jnp else d) % HW))
    mask = jnp.stack(masks).reshape(9, 1, HW)
    shifts = tuple(shifts)

    kernel = functools.partial(_fused_attention_kernel, num_heads=num_heads,
                               embed_dim=embed_dim, shifts=shifts)

    out_flat = pl.pallas_call(
        kernel,
        out_shape=jax.ShapeDtypeStruct((N, C, HW), jnp.float32),
        grid_spec=pltpu.PrefetchScalarGridSpec(
            num_scalar_prefetch=0,
            grid=(n_blocks,),
            in_specs=[
                pl.BlockSpec((nb, C, HW), lambda i: (i, 0, 0)),
                pl.BlockSpec((3 * hidden, 9 * C), lambda i: (0, 0)),
                pl.BlockSpec((3 * hidden, 1), lambda i: (0, 0)),
                pl.BlockSpec((C, 9 * hidden), lambda i: (0, 0)),
                pl.BlockSpec((C, 1), lambda i: (0, 0)),
                pl.BlockSpec((C, 1), lambda i: (0, 0)),
                pl.BlockSpec((C, 1), lambda i: (0, 0)),
                pl.BlockSpec((9, 1, HW), lambda i: (0, 0, 0)),
            ],
            out_specs=pl.BlockSpec((nb, C, HW), lambda i: (i, 0, 0)),
        ),
        compiler_params=pltpu.CompilerParams(
            dimension_semantics=("parallel",)),
    )(x_flat, wqkv, bqkv, wp, bp, gamma, beta, mask)

    return out_flat.reshape(N, C, H, W)


# --------------------------------------------------------------------------
# Deterministic PyTorch-style parameter init + pure-JAX reference.
# --------------------------------------------------------------------------
def init_params(key, input_dim, embed_dim, num_heads):
    hidden = embed_dim * num_heads
    ks = jax.random.split(key, 8)

    def conv_init(kw, kb, cin, cout):
        bound = 1.0 / (cin * 9) ** 0.5
        w = jax.random.uniform(kw, (cout, cin, 3, 3), jnp.float32, -bound, bound)
        b = jax.random.uniform(kb, (cout,), jnp.float32, -bound, bound)
        return w, b

    wq, bq = conv_init(ks[0], ks[1], input_dim, hidden)
    wk, bk = conv_init(ks[2], ks[3], input_dim, hidden)
    wv, bv = conv_init(ks[4], ks[5], input_dim, hidden)
    wp, bp = conv_init(ks[6], ks[7], hidden, input_dim)
    return dict(wq=wq, bq=bq, wk=wk, bk=bk, wv=wv, bv=bv, wp=wp, bp=bp,
                gamma=jnp.ones((input_dim,), jnp.float32),
                beta=jnp.zeros((input_dim,), jnp.float32))


def ref_forward(x, p, *, num_heads, embed_dim):
    """Pure-JAX f32 replica of the PyTorch forward (linear_attn=True)."""
    N, C, H, W = x.shape
    hidden = embed_dim * num_heads
    dn = ("NCHW", "OIHW", "NCHW")

    def conv(x_, w, b):
        y = jax.lax.conv_general_dilated(
            x_, w, (1, 1), ((1, 1), (1, 1)), dimension_numbers=dn,
            precision=jax.lax.Precision.HIGHEST)
        return y + b[None, :, None, None]

    Q = conv(x, p["wq"], p["bq"]).reshape(N, num_heads, embed_dim, H * W)
    K = conv(x, p["wk"], p["bk"]).reshape(N, num_heads, embed_dim, H * W)
    V = conv(x, p["wv"], p["bv"]).reshape(N, num_heads, embed_dim, H * W)
    new_K = jnp.transpose(K, (0, 2, 3, 1))
    new_Q = jnp.transpose(Q, (0, 2, 1, 3))
    new_V = jnp.transpose(V, (0, 2, 1, 3))
    Q_sm = jax.nn.softmax(new_Q, axis=-2)
    K_sm = jax.nn.softmax(new_K, axis=-1)
    KV = jnp.matmul(new_V, K_sm)
    Y = jnp.matmul(KV, Q_sm)
    new_Y = jnp.concatenate([Y[:, :, h, :] for h in range(num_heads)], axis=1)
    new_Y = new_Y.reshape(N, hidden, H, W)
    out = conv(new_Y, p["wp"], p["bp"])
    mu = out.mean(axis=(1, 2, 3), keepdims=True)
    var = ((out - mu) ** 2).mean(axis=(1, 2, 3), keepdims=True)
    out = (out - mu) / jnp.sqrt(var + 1e-5)
    return out * p["gamma"][None, :, None, None] + p["beta"][None, :, None, None]


if __name__ == "__main__":
    C, H, W = 4, 16, 16                # input_dim = 4
    embed_dim, num_heads = 8, 4        # hidden_dim = 32 (small synthetic config)

    _roll_matches_jnp()                # prime the roll-direction probe outside jit

    key = jax.random.PRNGKey(0)
    kx, kp = jax.random.split(key)
    params = init_params(kp, C, embed_dim, num_heads)

    # Tolerance accounts for bf16 MXU operands + approx reciprocal vs the
    # f32 Precision.HIGHEST reference (GroupNorm output is unit-scale).
    ATOL = RTOL = 5e-2

    # Check 1: batch=2, one sample per grid step (2 blocks -> both v7x TCs busy).
    x2 = jax.random.normal(kx, (2, C, H, W), jnp.float32)
    fwd1 = jax.jit(functools.partial(attention_forward, num_heads=num_heads,
                                     embed_dim=embed_dim, samples_per_block=1))
    out2 = jax.block_until_ready(fwd1(x2, params))
    ref2 = ref_forward(x2, params, num_heads=num_heads, embed_dim=embed_dim)
    assert out2.shape == (2, C, H, W), out2.shape
    err2 = float(jnp.max(jnp.abs(out2 - ref2)))
    assert jnp.allclose(out2, ref2, atol=ATOL, rtol=RTOL), f"max abs err {err2}"

    # Check 2: batch=4 with 2 samples per grid step (per-step overhead amortized).
    x4 = jax.random.normal(jax.random.PRNGKey(1), (4, C, H, W), jnp.float32)
    fwd2 = jax.jit(functools.partial(attention_forward, num_heads=num_heads,
                                     embed_dim=embed_dim, samples_per_block=2))
    out4 = jax.block_until_ready(fwd2(x4, params))
    ref4 = ref_forward(x4, params, num_heads=num_heads, embed_dim=embed_dim)
    err4 = float(jnp.max(jnp.abs(out4 - ref4)))
    assert jnp.allclose(out4, ref4, atol=ATOL, rtol=RTOL), f"max abs err {err4}"

    print("KERNEL_OK")
</pallas_src>

<mosaic_0001>
module attributes {stable_mosaic.version = 11 : i64} {
  func.func @k(%arg0: memref<8x256xf32, #tpu.memory_space<vmem>>, %arg1: memref<8x256xf32, #tpu.memory_space<vmem>>) attributes {dimension_semantics = [], scalar_prefetch = 0 : i64, scratch_operands = 0 : i64, tpu.core_type = #tpu.core_type<tc>} {
    %c0 = arith.constant 0 : index
    %c0_0 = arith.constant 0 : index
    %0 = vector.load %arg0[%c0, %c0_0] : memref<8x256xf32, #tpu.memory_space<vmem>>, vector<8x256xf32>
    %c1_i32 = arith.constant 1 : i32
    %1 = tpu.dynamic_rotate %0 by %c1_i32 dim 1 : vector<8x256xf32>, i32 -> vector<8x256xf32>
    %c0_1 = arith.constant 0 : index
    %c0_2 = arith.constant 0 : index
    %2 = vector.load %arg1[%c0_1, %c0_2] : memref<8x256xf32, #tpu.memory_space<vmem>>, vector<8x256xf32>
    tpu.vector_store %arg1[%c0_1, %c0_2], %1 {strides = array<i32>} : memref<8x256xf32, #tpu.memory_space<vmem>>, vector<8x256xf32>,
    return
  }
}

module attributes {stable_mosaic.version = 11 : i64} {
  func.func @_fused_attention_kernel(%arg0: i32, %arg1: memref<1x4x256xf32, #tpu.memory_space<vmem>>, %arg2: memref<96x36xbf16, #tpu.memory_space<vmem>>, %arg3: memref<96x1xf32, #tpu.memory_space<vmem>>, %arg4: memref<4x288xbf16, #tpu.memory_space<vmem>>, %arg5: memref<4x1xf32, #tpu.memory_space<vmem>>, %arg6: memref<4x1xf32, #tpu.memory_space<vmem>>, %arg7: memref<4x1xf32, #tpu.memory_space<vmem>>, %arg8: memref<9x1x256xf32, #tpu.memory_space<vmem>>, %arg9: memref<1x4x256xf32, #tpu.memory_space<vmem>>) attributes {dimension_semantics = [#tpu.dimension_semantics<parallel>], iteration_bounds = array<i64: 2>, scalar_prefetch = 0 : i64, scratch_operands = 0 : i64, tpu.core_type = #tpu.core_type<tc>, window_params = [{transform_indices = @transform_0, window_bounds = array<i64: 1, 4, 256>}, {pipeline_mode = #tpu.pipeline_mode<synchronous>, transform_indices = @transform_1, window_bounds = array<i64: 96, 36>}, {pipeline_mode = #tpu.pipeline_mode<synchronous>, transform_indices = @transform_2, window_bounds = array<i64: 96, 1>}, {pipeline_mode = #tpu.pipeline_mode<synchronous>, transform_indices = @transform_3, window_bounds = array<i64: 4, 288>}, {pipeline_mode = #tpu.pipeline_mode<synchronous>, transform_indices = @transform_4, window_bounds = array<i64: 4, 1>}, {pipeline_mode = #tpu.pipeline_mode<synchronous>, transform_indices = @transform_5, window_bounds = array<i64: 4, 1>}, {pipeline_mode = #tpu.pipeline_mode<synchronous>, transform_indices = @transform_6, window_bounds = array<i64: 4, 1>}, {pipeline_mode = #tpu.pipeline_mode<synchronous>, transform_indices = @transform_7, window_bounds = array<i64: 9, 1, 256>}, {transform_indices = @transform_8, window_bounds = array<i64: 1, 4, 256>}]} {
    %c0 = arith.constant 0 : index
    %c0_0 = arith.constant 0 : index
    %0 = vector.load %arg2[%c0, %c0_0] : memref<96x36xbf16, #tpu.memory_space<vmem>>, vector<96x36xbf16>
    %c0_1 = arith.constant 0 : index
    %c0_2 = arith.constant 0 : index
    %1 = vector.load %arg3[%c0_1, %c0_2] : memref<96x1xf32, #tpu.memory_space<vmem>>, vector<96x1xf32>
    %c0_3 = arith.constant 0 : index
    %c0_4 = arith.constant 0 : index
    %2 = vector.load %arg4[%c0_3, %c0_4] : memref<4x288xbf16, #tpu.memory_space<vmem>>, vector<4x288xbf16>
    %c0_5 = arith.constant 0 : index
    %c0_6 = arith.constant 0 : index
    %3 = vector.load %arg5[%c0_5, %c0_6] : memref<4x1xf32, #tpu.memory_space<vmem>>, vector<4x1xf32>
    %c0_7 = arith.constant 0 : index
    %c0_8 = arith.constant 0 : index
    %4 = vector.load %arg6[%c0_7, %c0_8] : memref<4x1xf32, #tpu.memory_space<vmem>>, vector<4x1xf32>
    %c0_9 = arith.constant 0 : index
    %c0_10 = arith.constant 0 : index
    %5 = vector.load %arg7[%c0_9, %c0_10] : memref<4x1xf32, #tpu.memory_space<vmem>>, vector<4x1xf32>
    %c0_11 = arith.constant 0 : index
    %c0_12 = arith.constant 0 : index
    %c0_13 = arith.constant 0 : index
    %6 = vector.load %arg1[%c0_11, %c0_12, %c0_13] : memref<1x4x256xf32, #tpu.memory_space<vmem>>, vector<1x4x256xf32>
    %7 = vector.shape_cast %6 : vector<1x4x256xf32> to vector<4x256xf32>
    %c17_i32 = arith.constant 17 : i32
    %8 = tpu.dynamic_rotate %7 by %c17_i32 dim 1 : vector<4x256xf32>, i32 -> vector<4x256xf32>
    %c0_14 = arith.constant 0 : index
    %c0_15 = arith.constant 0 : index
    %c0_16 = arith.constant 0 : index
    %9 = vector.load %arg8[%c0_14, %c0_15, %c0_16] : memref<9x1x256xf32, #tpu.memory_space<vmem>>, vector<1x1x256xf32>
    %10 = vector.shape_cast %9 : vector<1x1x256xf32> to vector<1x256xf32>
    %11 = vector.broadcast %10 : vector<1x256xf32> to vector<4x256xf32>
    %12 = arith.mulf %8, %11 : vector<4x256xf32>
    %c16_i32 = arith.constant 16 : i32
    %13 = tpu.dynamic_rotate %7 by %c16_i32 dim 1 : vector<4x256xf32>, i32 -> vector<4x256xf32>
    %c1 = arith.constant 1 : index
    %c0_17 = arith.constant 0 : index
    %c0_18 = arith.constant 0 : index
    %14 = vector.load %arg8[%c1, %c0_17, %c0_18] : memref<9x1x256xf32, #tpu.memory_space<vmem>>, vector<1x1x256xf32>
    %15 = vector.shape_cast %14 : vector<1x1x256xf32> to vector<1x256xf32>
    %16 = vector.broadcast %15 : vector<1x256xf32> to vector<4x256xf32>
    %17 = arith.mulf %13, %16 : vector<4x256xf32>
    %c15_i32 = arith.constant 15 : i32
    %18 = tpu.dynamic_rotate %7 by %c15_i32 dim 1 : vector<4x256xf32>, i32 -> vector<4x256xf32>
    %c2 = arith.constant 2 : index
    %c0_19 = arith.constant 0 : index
    %c0_20 = arith.constant 0 : index
    %19 = vector.load %arg8[%c2, %c0_19, %c0_20] : memref<9x1x256xf32, #tpu.memory_space<vmem>>, vector<1x1x256xf32>
    %20 = vector.shape_cast %19 : vector<1x1x256xf32> to vector<1x256xf32>
    %21 = vector.broadcast %20 : vector<1x256xf32> to vector<4x256xf32>
    %22 = arith.mulf %18, %21 : vector<4x256xf32>
    %c1_i32 = arith.constant 1 : i32
    %23 = tpu.dynamic_rotate %7 by %c1_i32 dim 1 : vector<4x256xf32>, i32 -> vector<4x256xf32>
    %c3 = arith.constant 3 : index
    %c0_21 = arith.constant 0 : index
    %c0_22 = arith.constant 0 : index
    %24 = vector.load %arg8[%c3, %c0_21, %c0_22] : memref<9x1x256xf32, #tpu.memory_space<vmem>>, vector<1x1x256xf32>
    %25 = vector.shape_cast %24 : vector<1x1x256xf32> to vector<1x256xf32>
    %26 = vector.broadcast %25 : vector<1x256xf32> to vector<4x256xf32>
    %27 = arith.mulf %23, %26 : vector<4x256xf32>
    %c255_i32 = arith.constant 255 : i32
    %28 = tpu.dynamic_rotate %7 by %c255_i32 dim 1 : vector<4x256xf32>, i32 -> vector<4x256xf32>
    %c5 = arith.constant 5 : index
    %c0_23 = arith.constant 0 : index
    %c0_24 = arith.constant 0 : index
    %29 = vector.load %arg8[%c5, %c0_23, %c0_24] : memref<9x1x256xf32, #tpu.memory_space<vmem>>, vector<1x1x256xf32>
    %30 = vector.shape_cast %29 : vector<1x1x256xf32> to vector<1x256xf32>
    %31 = vector.broadcast %30 : vector<1x256xf32> to vector<4x256xf32>
    %32 = arith.mulf %28, %31 : vector<4x256xf32>
    %c241_i32 = arith.constant 241 : i32
    %33 = tpu.dynamic_rotate %7 by %c241_i32 dim 1 : vector<4x256xf32>, i32 -> vector<4x256xf32>
    %c6 = arith.constant 6 : index
    %c0_25 = arith.constant 0 : index
    %c0_26 = arith.constant 0 : index
    %34 = vector.load %arg8[%c6, %c0_25, %c0_26] : memref<9x1x256xf32, #tpu.memory_space<vmem>>, vector<1x1x256xf32>
    %35 = vector.shape_cast %34 : vector<1x1x256xf32> to vector<1x256xf32>
    %36 = vector.broadcast %35 : vector<1x256xf32> to vector<4x256xf32>
    %37 = arith.mulf %33, %36 : vector<4x256xf32>
    %c240_i32 = arith.constant 240 : i32
    %38 = tpu.dynamic_rotate %7 by %c240_i32 dim 1 : vector<4x256xf32>, i32 -> vector<4x256xf32>
    %c7 = arith.constant 7 : index
    %c0_27 = arith.constant 0 : index
    %c0_28 = arith.constant 0 : index
    %39 = vector.load %arg8[%c7, %c0_27, %c0_28] : memref<9x1x256xf32, #tpu.memory_space<vmem>>, vector<1x1x256xf32>
    %40 = vector.shape_cast %39 : vector<1x1x256xf32> to vector<1x256xf32>
    %41 = vector.broadcast %40 : vector<1x256xf32> to vector<4x256xf32>
    %42 = arith.mulf %38, %41 : vector<4x256xf32>
    %c239_i32 = arith.constant 239 : i32
    %43 = tpu.dynamic_rotate %7 by %c239_i32 dim 1 : vector<4x256xf32>, i32 -> vector<4x256xf32>
    %c8 = arith.constant 8 : index
    %c0_29 = arith.constant 0 : index
    %c0_30 = arith.constant 0 : index
    %44 = vector.load %arg8[%c8, %c0_29, %c0_30] : memref<9x1x256xf32, #tpu.memory_space<vmem>>, vector<1x1x256xf32>
    %45 = vector.shape_cast %44 : vector<1x1x256xf32> to vector<1x256xf32>
    %46 = vector.broadcast %45 : vector<1x256xf32> to vector<4x256xf32>
    %47 = arith.mulf %43, %46 : vector<4x256xf32>
    %48 = tpu.concatenate %12, %17, %22, %27, %7, %32, %37, %42, %47 in 0 : vector<4x256xf32>, vector<4x256xf32>, vector<4x256xf32>, vector<4x256xf32>, vector<4x256xf32>, vector<4x256xf32>, vector<4x256xf32>, vector<4x256xf32>, vector<4x256xf32> -> vector<36x256xf32>
    %49 = arith.truncf %48 : vector<36x256xf32> to vector<36x256xbf16>
    %cst = arith.constant dense<0.000000e+00> : vector<96x256xf32>
    %50 = tpu.matmul %0, %49, %cst {dimension_numbers = #tpu.dot_dimension_numbers<[1], [0], [0], [1], [0, 0, 1, 1], [], []>} : vector<96x36xbf16>, vector<36x256xbf16>, vector<96x256xf32> -> vector<96x256xf32>
    %51 = vector.broadcast %1 : vector<96x1xf32> to vector<96x256xf32>
    %52 = arith.addf %50, %51 : vector<96x256xf32>
    %53 = vector.extract_strided_slice %52 {offsets = [32, 0], sizes = [8, 256], strides = [1, 1]} : vector<96x256xf32> to vector<8x256xf32>
    %54 = vector.extract_strided_slice %52 {offsets = [40, 0], sizes = [8, 256], strides = [1, 1]} : vector<96x256xf32> to vector<8x256xf32>
    %55 = vector.extract_strided_slice %52 {offsets = [48, 0], sizes = [8, 256], strides = [1, 1]} : vector<96x256xf32> to vector<8x256xf32>
    %56 = vector.extract_strided_slice %52 {offsets = [56, 0], sizes = [8, 256], strides = [1, 1]} : vector<96x256xf32> to vector<8x256xf32>
    %57 = arith.maximumf %53, %54 : vector<8x256xf32>
    %58 = arith.maximumf %57, %55 : vector<8x256xf32>
    %59 = arith.maximumf %58, %56 : vector<8x256xf32>
    %60 = arith.subf %53, %59 : vector<8x256xf32>
    %61 = math.exp %60 : vector<8x256xf32>
    %62 = arith.subf %54, %59 : vector<8x256xf32>
    %63 = math.exp %62 : vector<8x256xf32>
    %64 = arith.subf %55, %59 : vector<8x256xf32>
    %65 = math.exp %64 : vector<8x256xf32>
    %66 = arith.subf %56, %59 : vector<8x256xf32>
    %67 = math.exp %66 : vector<8x256xf32>
    %68 = arith.addf %61, %63 : vector<8x256xf32>
    %69 = arith.addf %68, %65 : vector<8x256xf32>
    %70 = arith.addf %69, %67 : vector<8x256xf32>
    %71 = tpu.reciprocal %70 {approx = true} : vector<8x256xf32> -> vector<8x256xf32>
    %72 = arith.mulf %61, %71 : vector<8x256xf32>
    %73 = arith.mulf %63, %71 : vector<8x256xf32>
    %74 = arith.mulf %65, %71 : vector<8x256xf32>
    %75 = arith.mulf %67, %71 : vector<8x256xf32>
    %76 = vector.extract_strided_slice %52 {offsets = [64, 0], sizes = [8, 256], strides = [1, 1]} : vector<96x256xf32> to vector<8x256xf32>
    %77 = vector.extract_strided_slice %52 {offsets = [72, 0], sizes = [8, 256], strides = [1, 1]} : vector<96x256xf32> to vector<8x256xf32>
    %78 = vector.extract_strided_slice %52 {offsets = [80, 0], sizes = [8, 256], strides = [1, 1]} : vector<96x256xf32> to vector<8x256xf32>
    %79 = vector.extract_strided_slice %52 {offsets = [88, 0], sizes = [8, 256], strides = [1, 1]} : vector<96x256xf32> to vector<8x256xf32>
    %80 = arith.mulf %76, %72 : vector<8x256xf32>
    %cst_31 = arith.constant dense<0.000000e+00> : vector<8xf32>
    %81 = vector.multi_reduction <add>, %80, %cst_31 [1] : vector<8x256xf32> to vector<8xf32>
    %82 = vector.shape_cast %81 : vector<8xf32> to vector<8x1xf32>
    %83 = arith.mulf %76, %73 : vector<8x256xf32>
    %cst_32 = arith.constant dense<0.000000e+00> : vector<8xf32>
    %84 = vector.multi_reduction <add>, %83, %cst_32 [1] : vector<8x256xf32> to vector<8xf32>
    %85 = vector.shape_cast %84 : vector<8xf32> to vector<8x1xf32>
    %86 = arith.mulf %76, %74 : vector<8x256xf32>
    %cst_33 = arith.constant dense<0.000000e+00> : vector<8xf32>
    %87 = vector.multi_reduction <add>, %86, %cst_33 [1] : vector<8x256xf32> to vector<8xf32>
    %88 = vector.shape_cast %87 : vector<8xf32> to vector<8x1xf32>
    %89 = arith.mulf %76, %75 : vector<8x256xf32>
    %cst_34 = arith.constant dense<0.000000e+00> : vector<8xf32>
    %90 = vector.multi_reduction <add>, %89, %cst_34 [1] : vector<8x256xf32> to vector<8xf32>
    %91 = vector.shape_cast %90 : vector<8xf32> to vector<8x1xf32>
    %92 = arith.mulf %77, %72 : vector<8x256xf32>
    %cst_35 = arith.constant dense<0.000000e+00> : vector<8xf32>
    %93 = vector.multi_reduction <add>, %92, %cst_35 [1] : vector<8x256xf32> to vector<8xf32>
    %94 = vector.shape_cast %93 : vector<8xf32> to vector<8x1xf32>
    %95 = arith.mulf %77, %73 : vector<8x256xf32>
    %cst_36 = arith.constant dense<0.000000e+00> : vector<8xf32>
    %96 = vector.multi_reduction <add>, %95, %cst_36 [1] : vector<8x256xf32> to vector<8xf32>
    %97 = vector.shape_cast %96 : vector<8xf32> to vector<8x1xf32>
    %98 = arith.mulf %77, %74 : vector<8x256xf32>
    %cst_37 = arith.constant dense<0.000000e+00> : vector<8xf32>
    %99 = vector.multi_reduction <add>, %98, %cst_37 [1] : vector<8x256xf32> to vector<8xf32>
    %100 = vector.shape_cast %99 : vector<8xf32> to vector<8x1xf32>
    %101 = arith.mulf %77, %75 : vector<8x256xf32>
    %cst_38 = arith.constant dense<0.000000e+00> : vector<8xf32>
    %102 = vector.multi_reduction <add>, %101, %cst_38 [1] : vector<8x256xf32> to vector<8xf32>
    %103 = vector.shape_cast %102 : vector<8xf32> to vector<8x1xf32>
    %104 = arith.mulf %78, %72 : vector<8x256xf32>
    %cst_39 = arith.constant dense<0.000000e+00> : vector<8xf32>
    %105 = vector.multi_reduction <add>, %104, %cst_39 [1] : vector<8x256xf32> to vector<8xf32>
    %106 = vector.shape_cast %105 : vector<8xf32> to vector<8x1xf32>
    %107 = arith.mulf %78, %73 : vector<8x256xf32>
    %cst_40 = arith.constant dense<0.000000e+00> : vector<8xf32>
    %108 = vector.multi_reduction <add>, %107, %cst_40 [1] : vector<8x256xf32> to vector<8xf32>
    %109 = vector.shape_cast %108 : vector<8xf32> to vector<8x1xf32>
    %110 = arith.mulf %78, %74 : vector<8x256xf32>
    %cst_41 = arith.constant dense<0.000000e+00> : vector<8xf32>
    %111 = vector.multi_reduction <add>, %110, %cst_41 [1] : vector<8x256xf32> to vector<8xf32>
    %112 = vector.shape_cast %111 : vector<8xf32> to vector<8x1xf32>
    %113 = arith.mulf %78, %75 : vector<8x256xf32>
    %cst_42 = arith.constant dense<0.000000e+00> : vector<8xf32>
    %114 = vector.multi_reduction <add>, %113, %cst_42 [1] : vector<8x256xf32> to vector<8xf32>
    %115 = vector.shape_cast %114 : vector<8xf32> to vector<8x1xf32>
    %116 = arith.mulf %79, %72 : vector<8x256xf32>
    %cst_43 = arith.constant dense<0.000000e+00> : vector<8xf32>
    %117 = vector.multi_reduction <add>, %116, %cst_43 [1] : vector<8x256xf32> to vector<8xf32>
    %118 = vector.shape_cast %117 : vector<8xf32> to vector<8x1xf32>
    %119 = arith.mulf %79, %73 : vector<8x256xf32>
    %cst_44 = arith.constant dense<0.000000e+00> : vector<8xf32>
    %120 = vector.multi_reduction <add>, %119, %cst_44 [1] : vector<8x256xf32> to vector<8xf32>
    %121 = vector.shape_cast %120 : vector<8xf32> to vector<8x1xf32>
    %122 = arith.mulf %79, %74 : vector<8x256xf32>
    %cst_45 = arith.constant dense<0.000000e+00> : vector<8xf32>
    %123 = vector.multi_reduction <add>, %122, %cst_45 [1] : vector<8x256xf32> to vector<8xf32>
    %124 = vector.shape_cast %123 : vector<8xf32> to vector<8x1xf32>
    %125 = arith.mulf %79, %75 : vector<8x256xf32>
    %cst_46 = arith.constant dense<0.000000e+00> : vector<8xf32>
    %126 = vector.multi_reduction <add>, %125, %cst_46 [1] : vector<8x256xf32> to vector<8xf32>
    %127 = vector.shape_cast %126 : vector<8xf32> to vector<8x1xf32>
    %128 = vector.extract_strided_slice %52 {offsets = [0, 0], sizes = [8, 256], strides = [1, 1]} : vector<96x256xf32> to vector<8x256xf32>
    %129 = vector.extract_strided_slice %52 {offsets = [8, 0], sizes = [8, 256], strides = [1, 1]} : vector<96x256xf32> to vector<8x256xf32>
    %130 = vector.extract_strided_slice %52 {offsets = [16, 0], sizes = [8, 256], strides = [1, 1]} : vector<96x256xf32> to vector<8x256xf32>
    %131 = vector.extract_strided_slice %52 {offsets = [24, 0], sizes = [8, 256], strides = [1, 1]} : vector<96x256xf32> to vector<8x256xf32>
    %132 = arith.maximumf %128, %129 : vector<8x256xf32>
    %133 = arith.maximumf %132, %130 : vector<8x256xf32>
    %134 = arith.maximumf %133, %131 : vector<8x256xf32>
    %135 = arith.subf %128, %134 : vector<8x256xf32>
    %136 = math.exp %135 : vector<8x256xf32>
    %137 = arith.subf %129, %134 : vector<8x256xf32>
    %138 = math.exp %137 : vector<8x256xf32>
    %139 = arith.subf %130, %134 : vector<8x256xf32>
    %140 = math.exp %139 : vector<8x256xf32>
    %141 = arith.subf %131, %134 : vector<8x256xf32>
    %142 = math.exp %141 : vector<8x256xf32>
    %143 = arith.addf %136, %138 : vector<8x256xf32>
    %144 = arith.addf %143, %140 : vector<8x256xf32>
    %145 = arith.addf %144, %142 : vector<8x256xf32>
    %146 = tpu.reciprocal %145 {approx = true} : vector<8x256xf32> -> vector<8x256xf32>
    %147 = vector.broadcast %82 : vector<8x1xf32> to vector<8x256xf32>
    %148 = arith.mulf %147, %136 : vector<8x256xf32>
    %149 = vector.broadcast %85 : vector<8x1xf32> to vector<8x256xf32>
    %150 = arith.mulf %149, %138 : vector<8x256xf32>
    %151 = arith.addf %148, %150 : vector<8x256xf32>
    %152 = vector.broadcast %88 : vector<8x1xf32> to vector<8x256xf32>
    %153 = arith.mulf %152, %140 : vector<8x256xf32>
    %154 = arith.addf %151, %153 : vector<8x256xf32>
    %155 = vector.broadcast %91 : vector<8x1xf32> to vector<8x256xf32>
    %156 = arith.mulf %155, %142 : vector<8x256xf32>
    %157 = arith.addf %154, %156 : vector<8x256xf32>
    %158 = arith.mulf %157, %146 : vector<8x256xf32>
    %159 = vector.broadcast %94 : vector<8x1xf32> to vector<8x256xf32>
    %160 = arith.mulf %159, %136 : vector<8x256xf32>
    %161 = vector.broadcast %97 : vector<8x1xf32> to vector<8x256xf32>
    %162 = arith.mulf %161, %138 : vector<8x256xf32>
    %163 = arith.addf %160, %162 : vector<8x256xf32>
    %164 = vector.broadcast %100 : vector<8x1xf32> to vector<8x256xf32>
    %165 = arith.mulf %164, %140 : vector<8x256xf32>
    %166 = arith.addf %163, %165 : vector<8x256xf32>
    %167 = vector.broadcast %103 : vector<8x1xf32> to vector<8x256xf32>
    %168 = arith.mulf %167, %142 : vector<8x256xf32>
    %169 = arith.addf %166, %168 : vector<8x256xf32>
    %170 = arith.mulf %169, %146 : vector<8x256xf32>
    %171 = vector.broadcast %106 : vector<8x1xf32> to vector<8x256xf32>
    %172 = arith.mulf %171, %136 : vector<8x256xf32>
    %173 = vector.broadcast %109 : vector<8x1xf32> to vector<8x256xf32>
    %174 = arith.mulf %173, %138 : vector<8x256xf32>
    %175 = arith.addf %172, %174 : vector<8x256xf32>
    %176 = vector.broadcast %112 : vector<8x1xf32> to vector<8x256xf32>
    %177 = arith.mulf %176, %140 : vector<8x256xf32>
    %178 = arith.addf %175, %177 : vector<8x256xf32>
    %179 = vector.broadcast %115 : vector<8x1xf32> to vector<8x256xf32>
    %180 = arith.mulf %179, %142 : vector<8x256xf32>
    %181 = arith.addf %178, %180 : vector<8x256xf32>
    %182 = arith.mulf %181, %146 : vector<8x256xf32>
    %183 = vector.broadcast %118 : vector<8x1xf32> to vector<8x256xf32>
    %184 = arith.mulf %183, %136 : vector<8x256xf32>
    %185 = vector.broadcast %121 : vector<8x1xf32> to vector<8x256xf32>
    %186 = arith.mulf %185, %138 : vector<8x256xf32>
    %187 = arith.addf %184, %186 : vector<8x256xf32>
    %188 = vector.broadcast %124 : vector<8x1xf32> to vector<8x256xf32>
    %189 = arith.mulf %188, %140 : vector<8x256xf32>
    %190 = arith.addf %187, %189 : vector<8x256xf32>
    %191 = vector.broadcast %127 : vector<8x1xf32> to vector<8x256xf32>
    %192 = arith.mulf %191, %142 : vector<8x256xf32>
    %193 = arith.addf %190, %192 : vector<8x256xf32>
    %194 = arith.mulf %193, %146 : vector<8x256xf32>
    %195 = tpu.concatenate %158, %170, %182, %194 in 0 : vector<8x256xf32>, vector<8x256xf32>, vector<8x256xf32>, vector<8x256xf32> -> vector<32x256xf32>
    %c17_i32_47 = arith.constant 17 : i32
    %196 = tpu.dynamic_rotate %195 by %c17_i32_47 dim 1 : vector<32x256xf32>, i32 -> vector<32x256xf32>
    %c0_48 = arith.constant 0 : index
    %c0_49 = arith.constant 0 : index
    %c0_50 = arith.constant 0 : index
    %197 = vector.load %arg8[%c0_48, %c0_49, %c0_50] : memref<9x1x256xf32, #tpu.memory_space<vmem>>, vector<1x1x256xf32>
    %198 = vector.shape_cast %197 : vector<1x1x256xf32> to vector<1x256xf32>
    %199 = vector.broadcast %198 : vector<1x256xf32> to vector<32x256xf32>
    %200 = arith.mulf %196, %199 : vector<32x256xf32>
    %c16_i32_51 = arith.constant 16 : i32
    %201 = tpu.dynamic_rotate %195 by %c16_i32_51 dim 1 : vector<32x256xf32>, i32 -> vector<32x256xf32>
    %c1_52 = arith.constant 1 : index
    %c0_53 = arith.constant 0 : index
    %c0_54 = arith.constant 0 : index
    %202 = vector.load %arg8[%c1_52, %c0_53, %c0_54] : memref<9x1x256xf32, #tpu.memory_space<vmem>>, vector<1x1x256xf32>
    %203 = vector.shape_cast %202 : vector<1x1x256xf32> to vector<1x256xf32>
    %204 = vector.broadcast %203 : vector<1x256xf32> to vector<32x256xf32>
    %205 = arith.mulf %201, %204 : vector<32x256xf32>
    %c15_i32_55 = arith.constant 15 : i32
    %206 = tpu.dynamic_rotate %195 by %c15_i32_55 dim 1 : vector<32x256xf32>, i32 -> vector<32x256xf32>
    %c2_56 = arith.constant 2 : index
    %c0_57 = arith.constant 0 : index
    %c0_58 = arith.constant 0 : index
    %207 = vector.load %arg8[%c2_56, %c0_57, %c0_58] : memref<9x1x256xf32, #tpu.memory_space<vmem>>, vector<1x1x256xf32>
    %208 = vector.shape_cast %207 : vector<1x1x256xf32> to vector<1x256xf32>
    %209 = vector.broadcast %208 : vector<1x256xf32> to vector<32x256xf32>
    %210 = arith.mulf %206, %209 : vector<32x256xf32>
    %c1_i32_59 = arith.constant 1 : i32
    %211 = tpu.dynamic_rotate %195 by %c1_i32_59 dim 1 : vector<32x256xf32>, i32 -> vector<32x256xf32>
    %c3_60 = arith.constant 3 : index
    %c0_61 = arith.constant 0 : index
    %c0_62 = arith.constant 0 : index
    %212 = vector.load %arg8[%c3_60, %c0_61, %c0_62] : memref<9x1x256xf32, #tpu.memory_space<vmem>>, vector<1x1x256xf32>
    %213 = vector.shape_cast %212 : vector<1x1x256xf32> to vector<1x256xf32>
    %214 = vector.broadcast %213 : vector<1x256xf32> to vector<32x256xf32>
    %215 = arith.mulf %211, %214 : vector<32x256xf32>
    %c255_i32_63 = arith.constant 255 : i32
    %216 = tpu.dynamic_rotate %195 by %c255_i32_63 dim 1 : vector<32x256xf32>, i32 -> vector<32x256xf32>
    %c5_64 = arith.constant 5 : index
    %c0_65 = arith.constant 0 : index
    %c0_66 = arith.constant 0 : index
    %217 = vector.load %arg8[%c5_64, %c0_65, %c0_66] : memref<9x1x256xf32, #tpu.memory_space<vmem>>, vector<1x1x256xf32>
    %218 = vector.shape_cast %217 : vector<1x1x256xf32> to vector<1x256xf32>
    %219 = vector.broadcast %218 : vector<1x256xf32> to vector<32x256xf32>
    %220 = arith.mulf %216, %219 : vector<32x256xf32>
    %c241_i32_67 = arith.constant 241 : i32
    %221 = tpu.dynamic_rotate %195 by %c241_i32_67 dim 1 : vector<32x256xf32>, i32 -> vector<32x256xf32>
    %c6_68 = arith.constant 6 : index
    %c0_69 = arith.constant 0 : index
    %c0_70 = arith.constant 0 : index
    %222 = vector.load %arg8[%c6_68, %c0_69, %c0_70] : memref<9x1x256xf32, #tpu.memory_space<vmem>>, vector<1x1x256xf32>
    %223 = vector.shape_cast %222 : vector<1x1x256xf32> to vector<1x256xf32>
    %224 = vector.broadcast %223 : vector<1x256xf32> to vector<32x256xf32>
    %225 = arith.mulf %221, %224 : vector<32x256xf32>
    %c240_i32_71 = arith.constant 240 : i32
    %226 = tpu.dynamic_rotate %195 by %c240_i32_71 dim 1 : vector<32x256xf32>, i32 -> vector<32x256xf32>
    %c7_72 = arith.constant 7 : index
    %c0_73 = arith.constant 0 : index
    %c0_74 = arith.constant 0 : index
    %227 = vector.load %arg8[%c7_72, %c0_73, %c0_74] : memref<9x1x256xf32, #tpu.memory_space<vmem>>, vector<1x1x256xf32>
    %228 = vector.shape_cast %227 : vector<1x1x256xf32> to vector<1x256xf32>
    %229 = vector.broadcast %228 : vector<1x256xf32> to vector<32x256xf32>
    %230 = arith.mulf %226, %229 : vector<32x256xf32>
    %c239_i32_75 = arith.constant 239 : i32
    %231 = tpu.dynamic_rotate %195 by %c239_i32_75 dim 1 : vector<32x256xf32>, i32 -> vector<32x256xf32>
    %c8_76 = arith.constant 8 : index
    %c0_77 = arith.constant 0 : index
    %c0_78 = arith.constant 0 : index
    %232 = vector.load %arg8[%c8_76, %c0_77, %c0_78] : memref<9x1x256xf32, #tpu.memory_space<vmem>>, vector<1x1x256xf32>
    %233 = vector.shape_cast %232 : vector<1x1x256xf32> to vector<1x256xf32>
    %234 = vector.broadcast %233 : vector<1x256xf32> to vector<32x256xf32>
    %235 = arith.mulf %231, %234 : vector<32x256xf32>
    %236 = tpu.concatenate %200, %205, %210, %215, %195, %220, %225, %230, %235 in 0 : vector<32x256xf32>, vector<32x256xf32>, vector<32x256xf32>, vector<32x256xf32>, vector<32x256xf32>, vector<32x256xf32>, vector<32x256xf32>, vector<32x256xf32>, vector<32x256xf32> -> vector<288x256xf32>
    %237 = arith.truncf %236 : vector<288x256xf32> to vector<288x256xbf16>
    %cst_79 = arith.constant dense<0.000000e+00> : vector<4x256xf32>
    %238 = tpu.matmul %2, %237, %cst_79 {dimension_numbers = #tpu.dot_dimension_numbers<[1], [0], [0], [1], [0, 0, 1, 1], [], []>} : vector<4x288xbf16>, vector<288x256xbf16>, vector<4x256xf32> -> vector<4x256xf32>
    %239 = vector.broadcast %3 : vector<4x1xf32> to vector<4x256xf32>
    %240 = arith.addf %238, %239 : vector<4x256xf32>
    %241 = vector.shape_cast %240 : vector<4x256xf32> to vector<1x4x256xf32>
    %cst_80 = arith.constant dense<0.000000e+00> : vector<1xf32>
    %242 = vector.multi_reduction <add>, %241, %cst_80 [1, 2] : vector<1x4x256xf32> to vector<1xf32>
    %243 = vector.shape_cast %242 : vector<1xf32> to vector<1x1x1xf32>
    %244 = vector.extract %243[0, 0, 0] : f32 from vector<1x1x1xf32>
    %cst_81 = arith.constant 1.024000e+03 : f32
    %245 = arith.divf %244, %cst_81 : f32
    %246 = vector.broadcast %245 : f32 to vector<4x256xf32>
    %247 = arith.subf %240, %246 : vector<4x256xf32>
    %248 = vector.broadcast %245 : f32 to vector<4x256xf32>
    %249 = arith.subf %240, %248 : vector<4x256xf32>
    %250 = arith.mulf %247, %249 : vector<4x256xf32>
    %251 = vector.shape_cast %250 : vector<4x256xf32> to vector<1x4x256xf32>
    %cst_82 = arith.constant dense<0.000000e+00> : vector<1xf32>
    %252 = vector.multi_reduction <add>, %251, %cst_82 [1, 2] : vector<1x4x256xf32> to vector<1xf32>
    %253 = vector.shape_cast %252 : vector<1xf32> to vector<1x1x1xf32>
    %254 = vector.extract %253[0, 0, 0] : f32 from vector<1x1x1xf32>
    %cst_83 = arith.constant 1.024000e+03 : f32
    %255 = arith.divf %254, %cst_83 : f32
    %cst_84 = arith.constant 9.99999974E-6 : f32
    %256 = arith.addf %255, %cst_84 : f32
    %257 = math.rsqrt %256 : f32
    %258 = vector.broadcast %245 : f32 to vector<4x256xf32>
    %259 = arith.subf %240, %258 : vector<4x256xf32>
    %260 = vector.broadcast %257 : f32 to vector<4x256xf32>
    %261 = arith.mulf %259, %260 : vector<4x256xf32>
    %262 = vector.broadcast %4 : vector<4x1xf32> to vector<4x256xf32>
    %263 = arith.mulf %261, %262 : vector<4x256xf32>
    %264 = vector.broadcast %5 : vector<4x1xf32> to vector<4x256xf32>
    %265 = arith.addf %263, %264 : vector<4x256xf32>
    %c0_85 = arith.constant 0 : index
    %c0_86 = arith.constant 0 : index
    %c0_87 = arith.constant 0 : index
    %266 = vector.load %arg9[%c0_85, %c0_86, %c0_87] : memref<1x4x256xf32, #tpu.memory_space<vmem>>, vector<1x4x256xf32>
    %267 = vector.shape_cast %266 : vector<1x4x256xf32> to vector<4x256xf32>
    %268 = vector.shape_cast %265 : vector<4x256xf32> to vector<1x4x256xf32>
    tpu.vector_store %arg9[%c0_85, %c0_86, %c0_87], %268 {strides = array<i32>} : memref<1x4x256xf32, #tpu.memory_space<vmem>>, vector<1x4x256xf32>,
    return
  }
  func.func @transform_0(%arg0: i32) -> (i32, i32, i32) {
    %c0_i32 = arith.constant 0 : i32
    %c0_i32_0 = arith.constant 0 : i32
    %c0_i32_1 = arith.constant 0 : i32
    return %arg0, %c0_i32, %c0_i32_0 : i32, i32, i32
  }
  func.func @transform_1(%arg0: i32) -> (i32, i32) {
    %c0_i32 = arith.constant 0 : i32
    %c0_i32_0 = arith.constant 0 : i32
    %c0_i32_1 = arith.constant 0 : i32
    return %c0_i32, %c0_i32_0 : i32, i32
  }
  func.func @transform_2(%arg0: i32) -> (i32, i32) {
    %c0_i32 = arith.constant 0 : i32
    %c0_i32_0 = arith.constant 0 : i32
    %c0_i32_1 = arith.constant 0 : i32
    return %c0_i32, %c0_i32_0 : i32, i32
  }
  func.func @transform_3(%arg0: i32) -> (i32, i32) {
    %c0_i32 = arith.constant 0 : i32
    %c0_i32_0 = arith.constant 0 : i32
    %c0_i32_1 = arith.constant 0 : i32
    return %c0_i32, %c0_i32_0 : i32, i32
  }
  func.func @transform_4(%arg0: i32) -> (i32, i32) {
    %c0_i32 = arith.constant 0 : i32
    %c0_i32_0 = arith.constant 0 : i32
    %c0_i32_1 = arith.constant 0 : i32
    return %c0_i32, %c0_i32_0 : i32, i32
  }
  func.func @transform_5(%arg0: i32) -> (i32, i32) {
    %c0_i32 = arith.constant 0 : i32
    %c0_i32_0 = arith.constant 0 : i32
    %c0_i32_1 = arith.constant 0 : i32
    return %c0_i32, %c0_i32_0 : i32, i32
  }
  func.func @transform_6(%arg0: i32) -> (i32, i32) {
    %c0_i32 = arith.constant 0 : i32
    %c0_i32_0 = arith.constant 0 : i32
    %c0_i32_1 = arith.constant 0 : i32
    return %c0_i32, %c0_i32_0 : i32, i32
  }
  func.func @transform_7(%arg0: i32) -> (i32, i32, i32) {
    %c0_i32 = arith.constant 0 : i32
    %c0_i32_0 = arith.constant 0 : i32
    %c0_i32_1 = arith.constant 0 : i32
    %c0_i32_2 = arith.constant 0 : i32
    return %c0_i32, %c0_i32_0, %c0_i32_1 : i32, i32, i32
  }
  func.func @transform_8(%arg0: i32) -> (i32, i32, i32) {
    %c0_i32 = arith.constant 0 : i32
    %c0_i32_0 = arith.constant 0 : i32
    %c0_i32_1 = arith.constant 0 : i32
    return %arg0, %c0_i32, %c0_i32_0 : i32, i32, i32
  }
}

</mosaic_0001>

<bundles_post_ra>
// kernel: tpu_custom_call.1
= control target key start
LH: loop header
LB: loop body
LE: loop exit
PB: predicated region body
PF: predicated region fallthrough
CT: control target
= control target key end

     0   :  { %6 = vsyncpa [#allocation3], 0  ;;  %s115_s0 = inlined_call_operand.hbm [shape: f32[8,256], index: 0, kind: input, shape index: {}]   ;;  %s116_s1 = inlined_call_operand.hbm [shape: f32[8,256], index: 1, kind: output, shape index: {}]  }
   0x1   :  { %7 = vsyncpa [#allocation4], 0  ;;  %s96_s6 = smov [#allocation2]  }
   0x2   :  { %s14_s7 = sshll.u32 %s96_s6, 4  ;;  %s15_s7 = int_to_ptr.vmem [resolvable:$true] %s14_s7 }
   0x3   :  { %s60_s8 = scalar_lea.vmem %s15_s7, 256  ;;  %p65_p1 = scmp.lt.s32.totalorder %s15_s7, %s15_s7 }
   0x4   :  { %p61_p0 = scmp.ne.s32.totalorder %s15_s7, %s60_s8  ;;  %p66_p2 = scmp.lt.s32.totalorder %s60_s8, %s60_s8 }
   0x6   :  { %p67_p3 = por %p66_p2, %p65_p1 }
   0x8   :  { %p68_p4 = pnand %p67_p3, %p61_p0 }
   0xa   :  { %71 = shalt.err (!%p68_p4)
}
   0xb   :  { %17 = dma.hbm_to_vmem [thread:$0]  %s115_s0, 256, %s15_s7, [#allocation3]  }
   0xc   :  { %92 = dma.done.wait [#allocation3], 256  }
   0xd   :  { %93 = vsyncadd [#allocation3], 4294967040  ;;  %v21_v0 = vld [vmem:[#allocation2] sm:$0xff]  ;;  %s97_s11 = smov 1   ;;  %v22_v1 = vld [vmem:[#allocation2 + $0x8] sm:$0xff]  ;;  %v27_v2 = vlaneseq  ;;  %s98_s12 = smov [#allocation5]  }
   0xe   :  { %23 = vrot.lane.b32.xlu0 %v21_v0, %s97_s11  ;;  %s40_s13 = sshll.u32 %s98_s12, 4  ;;  %s41_s13 = int_to_ptr.vmem [resolvable:$true] %s40_s13 }
   0xf   :  { %v28_v3 = vand.u32 127, %v27_v2  ;;  %s72_s0 = scalar_lea.vmem %s41_s13, 256  ;;  %p77_p6 = scmp.lt.s32.totalorder %s41_s13, %s41_s13 }
  0x10   :  { %p73_p5 = scmp.ne.s32.totalorder %s41_s13, %s72_s0  ;;  %p78_p7 = scmp.lt.s32.totalorder %s72_s0, %s72_s0 }
  0x11   :  { %vm29_vm0 = vcmp.lt.s32.totalorder %v28_v3, 1 }
  0x12   :  { %25 = vrot.lane.b32.xlu0 %v22_v1, %s97_s11  ;;  %p79_p8 = por %p78_p7, %p77_p6 }
  0x14   :  { %p80_p9 = pnand %p79_p8, %p73_p5 }
  0x80   :  { %v24_v4 = vpop.permute.xlu0 %23 }
  0x84   :  { %v26_v5 = vpop.permute.xlu0 %25 }
  0x85   :  { %v30_v6 = vsel %vm29_vm0, %v24_v4, %v26_v5  ;;  %v31_v7 = vsel %vm29_vm0, %v26_v5, %v24_v4 }
  0x86   :  { %32 = vst [vmem:[#allocation5] sm:$0xff] %v31_v7  ;;  %33 = vst [vmem:[#allocation5 + $0x8] sm:$0xff] %v30_v6 }
  0x87   :  { %83 = shalt.err (!%p80_p9)
}
  0x88   :  { %43 = dma.vmem_to_hbm [thread:$0]  %s41_s13, 256, %s116_s1, [#allocation4]  }
  0x89   :  { %94 = dma.done.wait [#allocation4], 256  }
  0x8a   :  { %95 = vsyncadd [#allocation4], 4294967040 }
  0x8b   :  { %47 = vsyncpa [#allocation3], 1 }
  0x8c   :  { %48 = vsyncpa [#allocation4], 1 }

// kernel: attention_forward.1
= control target key start
LH: loop header
LB: loop body
LE: loop exit
PB: predicated region body
PF: predicated region fallthrough
CT: control target
= control target key end

     0   :  { %s1683_s27 = smov 0   ;;  %s2429_s0 = inlined_call_operand.vmem [shape: f32[2,4,256], index: 0, kind: input, shape index: {}]   ;;  %s2430_s1 = inlined_call_operand.vmem [shape: bf16[96,36], index: 1, kind: input, shape index: {}]   ;;  %s2431_s2 = inlined_call_operand.vmem [shape: f32[96,1], index: 2, kind: input, shape index: {}]   ;;  %s2432_s3 = inlined_call_operand.vmem [shape: bf16[4,288], index: 3, kind: input, shape index: {}]   ;;  %s2433_s4 = inlined_call_operand.vmem [shape: f32[4,1], index: 4, kind: input, shape index: {}]   ;;  %s2434_s5 = inlined_call_operand.vmem [shape: f32[4,1], index: 5, kind: input, shape index: {}]   ;;  %s2435_s6 = inlined_call_operand.vmem [shape: f32[4,1], index: 6, kind: input, shape index: {}]   ;;  %s2436_s7 = inlined_call_operand.vmem [shape: f32[9,1,256], index: 7, kind: input, shape index: {}]   ;;  %s2437_s8 = inlined_call_operand.vmem [shape: f32[2,4,256], index: 8, kind: output, shape index: {}]  }
   0x1 LB: > { %s1510_s28 = sadd.s32 4294967295, %s1626_s27   ;;  %p1514_p0 = scmp.ge.s32.totalorder %s1626_s27, 1  ;;  %s1626_s27 = sphi %s1683_s27, %s18_s27  }
   0x2   : > { %p262_p1 = scmp.lt.s32.totalorder %s1626_s27, 3 }
   0x4   : > { %p263_p2 = pnand %p1514_p0, %p262_p1 }
   0x6   : > { %266 = sbr.rel (%p263_p2) target bundleno = 1546 (0x60a), region = 52 }
   0xb   : > { %p296_p3 = scmp.lt.s32.totalorder %s1510_s28, 1  ;;  %s1628_s11 = smov 127   ;;  %v1634_v2 = vmov 0   ;;  %v324_v3 = vld [vmem:[%s2431_s2 + $0x28] sm:$0xff]  ;;  %v323_v4 = vld [vmem:[%s2431_s2 + $0x20] sm:$0xff]  ;;  %v325_v5 = vld [vmem:[%s2431_s2 + $0x30] sm:$0xff]  ;;  %v343_v15 = vlaneseq }
   0xc   : > { %s1629_s12 = smov 111   ;;  %s1630_s13 = smov 112   ;;  %703 = vmatprep.mubr.bf16.mxu0 %v1634_v2  ;;  %1569 = vset.pattern.permute.xlu1 %v1634_v2  ;;  %v326_v6 = vld [vmem:[%s2431_s2 + $0x38] sm:$0xff]  ;;  %v329_v7 = vld [vmem:[%s2431_s2 + $0x50] sm:$0xff]  ;;  %v327_v9 = vld [vmem:[%s2431_s2 + $0x40] sm:$0xff]  ;;  %vm664_vm4 = vcmask 1041408  }
   0xd   : > { %s2455_s28 = smov (!%p296_p3, %s1510_s28), 1  ;;  %s1631_s14 = smov 113   ;;  %1568 = vset.pattern.permute.xlu0 %v1634_v2  ;;  %v330_v8 = vld [vmem:[%s2431_s2 + $0x58] sm:$0xff]  ;;  %v328_v10 = vld [vmem:[%s2431_s2 + $0x48] sm:$0xff]  ;;  %v319_v11 = vld [vmem:[%s2431_s2] sm:$0xff]  ;;  %v1776_v16 = vshrl.u32 %v343_v15, 7 }
   0xe   : > { %s1542_s29 = sshll.u32 %s2455_s28, 3  ;;  %s1632_s15 = smov 16   ;;  %v320_v12 = vld [vmem:[%s2431_s2 + $0x8] sm:$0xff]  ;;  %v321_v13 = vld [vmem:[%s2431_s2 + $0x10] sm:$0xff]  ;;  %v322_v14 = vld [vmem:[%s2431_s2 + $0x18] sm:$0xff]  ;;  %v1778_v17 = vand.u32 127, %v343_v15 }
   0xf   : > { %s300_s10 = scalar_lea.vmem %s2429_s0, %s1542_s29  ;;  %s1633_s16 = smov 1   ;;  %v1781_v20 = vsub.s32 0, %v1776_v16  ;;  %v1784_v21 = vsub.s32 1, %v1776_v16  ;;  %v1522_v22 = vld [vmem:[%s2436_s7 + $0xa] sm:$0x3]  ;;  %vm540_vm5 = vcmask 1043456  }
  0x10   : > { %v1699_v0 = vld [vmem:[%s300_s10] sm:$0xff]  ;;  %s1635_s17 = smov 17   ;;  %s1636_s18 = smov 15   ;;  %vm432_vm0 = vcmp.lt.s32.totalorder %v1778_v17, 127  ;;  %v1524_v23 = vld [vmem:[%s2436_s7 + $0xe] sm:$0x3] }
  0x11   : > { %428 = vrot.lane.b32.xlu1 %v1699_v0, %s1628_s11  ;;  %494 = vrot.lane.b32.xlu0 %v1699_v0, %s1629_s12  ;;  %v1707_v1 = vcombine.high %v1699_v0, %v1699_v0  ;;  %v1525_v24 = vld [vmem:[%s2436_s7 + $0x10] sm:$0x3]  ;;  %v1797_v26 = vrot.slane %v1522_v22, %v1781_v20  ;;  %v1800_v27 = vrot.slane %v1522_v22, %v1784_v21  ;;  %vm476_vm1 = vcmp.lt.s32.totalorder %v1778_v17, 112  ;;  %v1523_v31 = vld [vmem:[%s2436_s7 + $0xc] sm:$0x3]  ;;  %s305_s24 = scalar_lea.vmem %s2437_s8, %s1542_s29 }
  0x12   : > { %vm498_vm2 = vcmp.lt.s32.totalorder %v1778_v17, 111  ;;  %v1812_v32 = vrot.slane %v1524_v23, %v1781_v20  ;;  %v1815_v33 = vrot.slane %v1524_v23, %v1784_v21  ;;  %v1818_v34 = vrot.slane %v1525_v24, %v1784_v21  ;;  %v348_v15 = vld [vmem:[%s2436_s7] sm:$0x3] }
  0x13   : > { %2446 = vst [vmem:[#allocation2_spill] sm:$0xff] %v1797_v26  ;;  %2447 = vst [vmem:[#allocation3_spill] sm:$0xff] %v1800_v27  ;;  %v1821_v35 = vrot.slane %v1525_v24, %v1781_v20  ;;  %vm454_vm3 = vcmp.lt.s32.totalorder %v1778_v17, 113  ;;  %v1827_v40 = vrot.slane %v1523_v31, %v1781_v20  ;;  %v1830_v41 = vrot.slane %v1523_v31, %v1784_v21 }
  0x14   : > { %2448 = vst [vmem:[#allocation4_spill] sm:$0xff] %v1818_v34  ;;  %vm366_vm6 = vcmp.lt.s32.totalorder %v1778_v17, 16  ;;  %vm410_vm7 = vcmp.lt.s32.totalorder %v1778_v17, 1  ;;  %vm345_vm8 = vcmp.lt.s32.totalorder %v1778_v17, 17  ;;  %vm388_vm9 = vcmp.lt.s32.totalorder %v1778_v17, 15 }
  0x15   : > { %472 = vrot.lane.b32.xlu0 %v1699_v0, %s1630_s13  ;;  %430 = vrot.lane.b32.xlu1 %v1707_v1, %s1628_s11  ;;  %2449 = vst [vmem:[#allocation5_spill] sm:$0xff] %v1821_v35  ;;  %vm645_vm10 = vcmask 293888   ;;  %vm1308_vm11 = vcmask 261120  }
  0x19   : > { %474 = vrot.lane.b32.xlu1 %v1707_v1, %s1630_s13  ;;  %496 = vrot.lane.b32.xlu0 %v1707_v1, %s1629_s12 }
  0x1d   : > { %452 = vrot.lane.b32.xlu1 %v1707_v1, %s1631_s14  ;;  %450 = vrot.lane.b32.xlu0 %v1699_v0, %s1631_s14 }
  0x21   : > { %364 = vrot.lane.b32.xlu1 %v1707_v1, %s1632_s15  ;;  %362 = vrot.lane.b32.xlu0 %v1699_v0, %s1632_s15 }
  0x25   : > { %408 = vrot.lane.b32.xlu1 %v1707_v1, %s1633_s16  ;;  %406 = vrot.lane.b32.xlu0 %v1699_v0, %s1633_s16 }
  0x29   : > { %341 = vrot.lane.b32.xlu1 %v1707_v1, %s1635_s17  ;;  %339 = vrot.lane.b32.xlu0 %v1699_v0, %s1635_s17 }
  0x2d   : > { %386 = vrot.lane.b32.xlu1 %v1707_v1, %s1636_s18  ;;  %384 = vrot.lane.b32.xlu0 %v1699_v0, %s1636_s18 }
  0x31   : > { %582 = vperm.xlu1 %1569, %v324_v3   ;;  %577 = vperm.xlu0 %1568, %v323_v4  }
  0x35   : > { %587 = vperm.xlu1 %1569, %v325_v5   ;;  %592 = vperm.xlu0 %1568, %v326_v6  }
  0x39   : > { %607 = vperm.xlu1 %1569, %v329_v7   ;;  %612 = vperm.xlu0 %1568, %v330_v8  }
  0x3d   : > { %597 = vperm.xlu1 %1569, %v327_v9   ;;  %602 = vperm.xlu0 %1568, %v328_v10   ;;  %v1519_v10 = vld [vmem:[%s2436_s7 + $0x2] sm:$0x3] }
  0x41   : > { %557 = vperm.xlu1 %1569, %v319_v11   ;;  %562 = vperm.xlu0 %1568, %v320_v12   ;;  %v1521_v11 = vld [vmem:[%s2436_s7 + $0x6] sm:$0x3]  ;;  %v1865_v12 = vrot.slane %v1519_v10, %v1781_v20 }
  0x42   : > { %v1881_v22 = vrot.slane %v1521_v11, %v1784_v21 }
  0x45   : > { %567 = vperm.xlu1 %1569, %v321_v13   ;;  %572 = vperm.xlu0 %1568, %v322_v14   ;;  %v1868_v13 = vrot.slane %v1519_v10, %v1784_v21  ;;  %v1871_v14 = vrot.slane %v1521_v11, %v1781_v20 }
  0x83   : > { %v429_v18 = vpop.permute.xlu1 %428  ;;  %v495_v19 = vpop.permute.xlu0 %494 }
  0x87   : > { %v473_v25 = vpop.permute.xlu0 %472  ;;  %v431_v28 = vpop.permute.xlu1 %430 }
  0x88   : > { %v433_v29 = vsel %vm432_vm0, %v429_v18, %v431_v28  ;;  %v434_v30 = vsel %vm432_vm0, %v431_v28, %v429_v18 }
  0x89   : > { %v448_v36 = vmul.f32 %v1797_v26, %v433_v29  ;;  %v449_v37 = vmul.f32 %v1800_v27, %v434_v30  ;;  %v1892_v29 = vrot.slane %v348_v15, %v1781_v20  ;;  %v1895_v30 = vrot.slane %v348_v15, %v1784_v21 }
  0x8b   : > { %v475_v38 = vpop.permute.xlu1 %474  ;;  %v497_v39 = vpop.permute.xlu0 %496  ;;  %v530_v50 = vrot.slane %v448_v36, 4  ;;  %v531_v51 = vrot.slane %v449_v37, 4 }
  0x8c   : > { %v477_v42 = vsel %vm476_vm1, %v473_v25, %v475_v38  ;;  %v478_v43 = vsel %vm476_vm1, %v475_v38, %v473_v25  ;;  %v499_v44 = vsel %vm498_vm2, %v495_v19, %v497_v39  ;;  %v500_v45 = vsel %vm498_vm2, %v497_v39, %v495_v19  ;;  %v1520_v25 = vld [vmem:[%s2436_s7 + $0x4] sm:$0x3] }
  0x8d   : > { %v492_v46 = vmul.f32 %v1812_v32, %v477_v42  ;;  %v493_v47 = vmul.f32 %v1815_v33, %v478_v43  ;;  %v515_v48 = vmul.f32 %v1818_v34, %v500_v45  ;;  %v514_v49 = vmul.f32 %v1821_v35, %v499_v44 }
  0x8e   : > { %v546_v4 = vsel %vm540_vm5, %v1707_v1, %v531_v51  ;;  %v545_v6 = vsel %vm540_vm5, %v1699_v0, %v530_v50  ;;  %v1907_v44 = vrot.slane %v1520_v25, %v1781_v20  ;;  %v1910_v45 = vrot.slane %v1520_v25, %v1784_v21 }
  0x8f   : > { %v453_v52 = vpop.permute.xlu1 %452  ;;  %v451_v53 = vpop.permute.xlu0 %450  ;;  %v554_v54 = vpack.c.bf16 %v515_v48, %v515_v48  ;;  %v553_v55 = vpack.c.bf16 %v514_v49, %v514_v49  ;;  %v536_v56 = vrot.slane %v492_v46, 4  ;;  %v537_v59 = vrot.slane %v493_v47, 4 }
  0x90   : > { %v455_v57 = vsel %vm454_vm3, %v451_v53, %v453_v52  ;;  %v456_v58 = vsel %vm454_vm3, %v453_v52, %v451_v53 }
  0x91   : > { %v470_v60 = vmul.f32 %v1827_v40, %v455_v57  ;;  %v471_v61 = vmul.f32 %v1830_v41, %v456_v58  ;;  %1532 = vmatprep.subr.msk.bf16.mxu0 %vm664_vm4, %v554_v54  ;;  %v666_v62 = vsel %vm664_vm4, %v553_v55, 0 }
  0x92   : > { %682 = vmatpush1.bf16.msra.mxu0 %v666_v62  ;;  %v1571_v62 = vld [vmem:[%s2430_s1] sm:$0xff]  }
  0x93   : > { %v365_v63 = vpop.permute.xlu1 %364  ;;  %v363_v3 = vpop.permute.xlu0 %362  ;;  %v548_v5 = vsel %vm540_vm5, %v471_v61, %v537_v59  ;;  %v547_v7 = vsel %vm540_vm5, %v470_v60, %v536_v56 }
  0x94   : > { %v552_v8 = vpack.c.bf16 %v548_v5, %v546_v4  ;;  %v551_v9 = vpack.c.bf16 %v547_v7, %v545_v6  ;;  %v367_v18 = vsel %vm366_vm6, %v363_v3, %v365_v63  ;;  %v368_v19 = vsel %vm366_vm6, %v365_v63, %v363_v3  ;;  %v1572_v63 = vld [vmem:[%s2430_s1 + $0x8] sm:$0xff]   ;;  %v1573_v3 = vld [vmem:[%s2430_s1 + $0x10] sm:$0xff]   ;;  %v1574_v4 = vld [vmem:[%s2430_s1 + $0x18] sm:$0xff]  }
  0x95   : > { %v382_v36 = vmul.f32 %v1865_v12, %v368_v19  ;;  %v383_v37 = vmul.f32 %v1868_v13, %v367_v18  ;;  %v1575_v5 = vld [vmem:[%s2430_s1 + $0x20] sm:$0xff]   ;;  %v1576_v6 = vld [vmem:[%s2430_s1 + $0x28] sm:$0xff]  }
  0x96   : > { %683 = vmatprep.subr.bf16.mxu0 %v552_v8 }
  0x97   : > { %v409_v1 = vpop.permute.xlu1 %408  ;;  %684 = vmatpush1.bf16.msra.mxu0 %v551_v9  ;;  %v407_v0 = vpop.permute.xlu0 %406  ;;  %v518_v50 = vrot.slane %v382_v36, 4  ;;  %v519_v51 = vrot.slane %v383_v37, 4 }
  0x98   : > { %v411_v23 = vsel %vm410_vm7, %v407_v0, %v409_v1  ;;  %v412_v24 = vsel %vm410_vm7, %v409_v1, %v407_v0 }
  0x99   : > { %v426_v42 = vmul.f32 %v1871_v14, %v412_v24  ;;  %v427_v43 = vmul.f32 %v1881_v22, %v411_v23 }
  0x9b   : > { %v342_v28 = vpop.permute.xlu1 %341  ;;  %v340_v31 = vpop.permute.xlu0 %339  ;;  %v524_v54 = vrot.slane %v426_v42, 4  ;;  %v525_v20 = vrot.slane %v427_v43, 4 }
  0x9c   : > { %v346_v38 = vsel %vm345_vm8, %v340_v31, %v342_v28  ;;  %v347_v39 = vsel %vm345_vm8, %v342_v28, %v340_v31 }
  0x9d   : > { %v360_v46 = vmul.f32 %v1892_v29, %v347_v39  ;;  %v361_v47 = vmul.f32 %v1895_v30, %v346_v38 }
  0x9f   : > { %v387_v48 = vpop.permute.xlu1 %386  ;;  %v385_v49 = vpop.permute.xlu0 %384  ;;  %v542_v56 = vsel %vm540_vm5, %v361_v47, %v519_v51  ;;  %v541_v58 = vsel %vm540_vm5, %v360_v46, %v518_v50 }
  0xa0   : > { %v389_v52 = vsel %vm388_vm9, %v385_v49, %v387_v48  ;;  %v390_v53 = vsel %vm388_vm9, %v387_v48, %v385_v49 }
  0xa1   : > { %v404_v55 = vmul.f32 %v1907_v44, %v390_v53  ;;  %v405_v21 = vmul.f32 %v1910_v45, %v389_v52 }
  0xa3   : > { %v544_v57 = vsel %vm540_vm5, %v405_v21, %v525_v20  ;;  %v543_v59 = vsel %vm540_vm5, %v404_v55, %v524_v54 }
  0xa4   : > { %v550_v60 = vpack.c.bf16 %v544_v57, %v542_v56  ;;  %v549_v61 = vpack.c.bf16 %v543_v59, %v541_v58 }
  0xa6   : > { %685 = vmatprep.subr.bf16.mxu0 %v550_v60 }
  0xa7   : > { %686 = vmatpush1.bf16.msra.mxu0 %v549_v61 }
  0xaa   : > { %1533 = vmatmul.mubr.msk.bf16.vlgmr.msra.gmra.mxu0 %vm645_vm10, %v1571_v62 }
  0xab   : > { %713 = vmatprep.mubr.bf16.mxu0 %v1634_v2 }
  0xac   : > { %v1954_v7 = vpop.permute.xlu1 %582  ;;  %v1956_v8 = vpop.permute.xlu0 %577 }
  0xb0   : > { %v1958_v9 = vpop.permute.xlu1 %587  ;;  %v1960_v10 = vpop.permute.xlu0 %592 }
  0xb2   : > { %1534 = vmatmul.mubr.msk.bf16.gmra.mxu0 %vm645_vm10, %v1572_v63 }
  0xb3   : > { %723 = vmatprep.mubr.bf16.mxu0 %v1634_v2 }
  0xb4   : > { %v1962_v11 = vpop.permute.xlu1 %607  ;;  %v1964_v1 = vpop.permute.xlu0 %612 }
  0xb8   : > { %v1966_v0 = vpop.permute.xlu1 %597  ;;  %v1968_v15 = vpop.permute.xlu0 %602 }
  0xba   : > { %1535 = vmatmul.mubr.msk.bf16.gmra.mxu0 %vm645_vm10, %v1573_v3 }
  0xbb   : > { %733 = vmatprep.mubr.bf16.mxu0 %v1634_v2 }
  0xbc   : > { %v558_v19 = vpop.permute.xlu1 %557 }
  0xc0   : > { %v568_v36 = vpop.permute.xlu1 %567 }
  0xc2   : > { %1536 = vmatmul.mubr.msk.bf16.gmra.mxu0 %vm645_vm10, %v1574_v4 }
  0xc3   : > { %743 = vmatprep.mubr.bf16.mxu0 %v1634_v2 }
  0xca   : > { %1537 = vmatmul.mubr.msk.bf16.gmra.mxu0 %vm645_vm10, %v1575_v5 }
  0xcb   : > { %753 = vmatprep.mubr.bf16.mxu0 %v1634_v2 }
  0xd2   : > { %1538 = vmatmul.mubr.msk.bf16.gmra.mxu0 %vm645_vm10, %v1576_v6 }
  0xd3   : > { %1385 = vmatprep.mubr.bf16.mxu0 %v1634_v2  ;;  %v563_v2 = vpop.permute.xlu0 %562 }
  0xd7   : > { %v573_v48 = vpop.permute.xlu0 %572 }
 0x16a   : > { %v705_v18 = vpop.f32.mrf.mxu0 }
 0x16b   : > { %v706_v25 = vadd.f32 %v705_v18, %v558_v19 }
 0x16c   : > { %v707_v23 = vpop.f32.mrf.mxu0 }
 0x16d   : > { %v708_v37 = vadd.f32 %v707_v23, %v558_v19 }
 0x16e   : > { %v709_v24 = vpop.f32.mrf.mxu0 }
 0x16f   : > { %v710_v28 = vadd.f32 %v709_v24, %v563_v2 }
 0x170   : > { %v711_v31 = vpop.f32.mrf.mxu0 }
 0x171   : > { %v890_v38 = vmax.f32 %v706_v25, %v710_v28  ;;  %v712_v39 = vadd.f32 %v711_v31, %v563_v2 }
 0x172   : > { %v715_v42 = vpop.f32.mrf.mxu0 }
 0x173   : > { %v891_v43 = vmax.f32 %v708_v37, %v712_v39  ;;  %v716_v46 = vadd.f32 %v715_v42, %v568_v36 }
 0x174   : > { %v717_v47 = vpop.f32.mrf.mxu0 }
 0x175   : > { %v892_v49 = vmax.f32 %v890_v38, %v716_v46  ;;  %v718_v50 = vadd.f32 %v717_v47, %v568_v36 }
 0x176   : > { %v719_v51 = vpop.f32.mrf.mxu0 }
 0x177   : > { %v893_v52 = vmax.f32 %v891_v43, %v718_v50  ;;  %v720_v53 = vadd.f32 %v719_v51, %v573_v48 }
 0x178   : > { %v721_v54 = vpop.f32.mrf.mxu0 }
 0x179   : > { %v894_v20 = vmax.f32 %v892_v49, %v720_v53  ;;  %v722_v55 = vadd.f32 %v721_v54, %v573_v48 }
 0x17a   : > { %v725_v21 = vpop.f32.mrf.mxu0 }
 0x17b   : > { %v896_v56 = vsub.f32 %v706_v25, %v894_v20  ;;  %v902_v57 = vsub.f32 %v710_v28, %v894_v20  ;;  %v908_v58 = vsub.f32 %v716_v46, %v894_v20  ;;  %v914_v59 = vsub.f32 %v720_v53, %v894_v20 }
 0x17c   : > { %v895_v60 = vmax.f32 %v893_v52, %v722_v55  ;;  %v727_v61 = vpop.f32.mrf.mxu0  ;;  %v726_v38 = vadd.f32 %v725_v21, %v1956_v8 }
 0x17d   : > { %v898_v62 = vmul.f32 1.442695, %v896_v56  ;;  %v904_v63 = vmul.f32 1.442695, %v902_v57  ;;  %v910_v3 = vmul.f32 1.442695, %v908_v58  ;;  %v728_v47 = vadd.f32 %v727_v61, %v1956_v8 }
 0x17e   : > { %v897_v4 = vsub.f32 %v708_v37, %v895_v60  ;;  %v903_v5 = vsub.f32 %v712_v39, %v895_v60  ;;  %v909_v6 = vsub.f32 %v718_v50, %v895_v60  ;;  %v729_v18 = vpop.f32.mrf.mxu0  ;;  %v915_v19 = vsub.f32 %v722_v55, %v895_v60 }
 0x17f   : > { %1578 = vpow2.f32 %v898_v62  ;;  %v916_v31 = vmul.f32 1.442695, %v914_v59  ;;  %v730_v25 = vadd.f32 %v729_v18, %v1954_v7 }
 0x180   : > { %1580 = vpow2.f32 %v904_v63  ;;  %v900_v23 = vmul.f32 1.442695, %v897_v4  ;;  %v906_v2 = vmul.f32 1.442695, %v903_v5  ;;  %v731_v24 = vpop.f32.mrf.mxu0  ;;  %v912_v28 = vmul.f32 1.442695, %v909_v6 }
 0x181   : > { %1582 = vpow2.f32 %v910_v3  ;;  %v918_v39 = vmul.f32 1.442695, %v915_v19  ;;  %v732_v42 = vadd.f32 %v731_v24, %v1954_v7  ;;  %v764_v46 = vmax.f32 %v726_v38, %v730_v25 }
 0x182   : > { %v735_v36 = vpop.f32.mrf.mxu0  ;;  %1584 = vpow2.f32 %v900_v23 }
 0x183   : > { %v736_v37 = vadd.f32 %v735_v36, %v1958_v9  ;;  %1586 = vpow2.f32 %v906_v2  ;;  %v765_v52 = vmax.f32 %v728_v47, %v732_v42 }
 0x184   : > { %v737_v43 = vpop.f32.mrf.mxu0  ;;  %1588 = vpow2.f32 %v916_v31 }
 0x185   : > { %1590 = vpow2.f32 %v912_v28  ;;  %v738_v48 = vadd.f32 %v737_v43, %v1958_v9  ;;  %v766_v50 = vmax.f32 %v764_v46, %v736_v37 }
 0x186   : > { %v739_v49 = vpop.f32.mrf.mxu0  ;;  %1592 = vpow2.f32 %v918_v39 }
 0x187   : > { %v740_v51 = vadd.f32 %v739_v49, %v1960_v10  ;;  %v767_v55 = vmax.f32 %v765_v52, %v738_v48 }
 0x188   : > { %v741_v53 = vpop.f32.mrf.mxu0 }
 0x189   : > { %v768_v54 = vmax.f32 %v766_v50, %v740_v51  ;;  %v742_v20 = vadd.f32 %v741_v53, %v1960_v10 }
 0x18a   : > { %v745_v46 = vpop.f32.mrf.mxu0 }
 0x18b   : > { %v770_v7 = vsub.f32 %v726_v38, %v768_v54  ;;  %v776_v21 = vsub.f32 %v730_v25, %v768_v54  ;;  %v782_v56 = vsub.f32 %v736_v37, %v768_v54  ;;  %v788_v57 = vsub.f32 %v740_v51, %v768_v54 }
 0x18c   : > { %v1978_v58 = vpop.eup %1578  ;;  %v769_v8 = vmax.f32 %v767_v55, %v742_v20 }
 0x18d   : > { %v1980_v59 = vpop.eup %1580  ;;  %v772_v9 = vmul.f32 1.442695, %v770_v7  ;;  %v778_v60 = vmul.f32 1.442695, %v776_v21  ;;  %v784_v61 = vmul.f32 1.442695, %v782_v56 }
 0x18e   : > { %v790_v62 = vmul.f32 1.442695, %v788_v57  ;;  %v771_v63 = vsub.f32 %v728_v47, %v769_v8  ;;  %v777_v3 = vsub.f32 %v732_v42, %v769_v8  ;;  %v783_v4 = vsub.f32 %v738_v48, %v769_v8  ;;  %v1982_v5 = vpop.eup %1582  ;;  %v747_v48 = vpop.f32.mrf.mxu0 }
 0x18f   : > { %1594 = vpow2.f32 %v772_v9  ;;  %v920_v10 = vadd.f32 %v1980_v59, %v1978_v58  ;;  %v1986_v6 = vpop.eup %1584  ;;  %v789_v23 = vsub.f32 %v742_v20, %v769_v8  ;;  %v748_v27 = vadd.f32 %v747_v48, %v1966_v0 }
 0x190   : > { %1596 = vpow2.f32 %v778_v60  ;;  %v774_v18 = vmul.f32 1.442695, %v771_v63  ;;  %v780_v19 = vmul.f32 1.442695, %v777_v3  ;;  %v1988_v2 = vpop.eup %1586  ;;  %v786_v25 = vmul.f32 1.442695, %v783_v4  ;;  %v749_v20 = vpop.f32.mrf.mxu0 }
 0x191   : > { %1598 = vpow2.f32 %v784_v61  ;;  %v922_v24 = vadd.f32 %v1982_v5, %v920_v10  ;;  %v1991_v31 = vpop.eup %1588  ;;  %v921_v28 = vadd.f32 %v1988_v2, %v1986_v6  ;;  %v792_v37 = vmul.f32 1.442695, %v789_v23 }
 0x192   : > { %1600 = vpow2.f32 %v790_v62  ;;  %v1995_v36 = vpop.eup %1590  ;;  %v751_v8 = vpop.f32.mrf.mxu0 }
 0x193   : > { %1602 = vpow2.f32 %v774_v18  ;;  %v1998_v38 = vadd.f32 %v1991_v31, %v922_v24  ;;  %v923_v39 = vadd.f32 %v1995_v36, %v921_v28  ;;  %v2001_v42 = vpop.eup %1592 }
 0x194   : > { %1604 = vpow2.f32 %v780_v19  ;;  %v755_v61 = vpop.f32.mrf.mxu0 }
 0x195   : > { %1606 = vpow2.f32 %v786_v25  ;;  %v2004_v43 = vadd.f32 %v2001_v42, %v923_v39  ;;  %v756_v23 = vadd.f32 %v755_v61, %v1962_v11 }
 0x196   : > { %1608 = vpow2.f32 %v792_v37  ;;  %v757_v62 = vpop.f32.mrf.mxu0 }
 0x197   : > { %v758_v24 = vadd.f32 %v757_v62, %v1962_v11 }
 0x198   : > { %v759_v63 = vpop.f32.mrf.mxu0 }
 0x19a   : > { %v761_v4 = vpop.f32.mrf.mxu0 }
 0x19b   : > { %v762_v37 = vadd.f32 %v761_v4, %v1964_v1 }
 0x19c   : > { %v1595_v47 = vpop.eup %1594 }
 0x19d   : > { %v1597_v49 = vpop.eup %1596 }
 0x19e   : > { %v1599_v50 = vpop.eup %1598  ;;  %v794_v51 = vadd.f32 %v1597_v49, %v1595_v47 }
 0x19f   : > { %v2006_v52 = vpop.eup %1600 }
 0x1a0   : > { %v1603_v53 = vpop.eup %1602  ;;  %v796_v54 = vadd.f32 %v1599_v50, %v794_v51 }
 0x1a1   : > { %v1605_v55 = vpop.eup %1604 }
 0x1a2   : > { %v798_v7 = vadd.f32 %v2006_v52, %v796_v54  ;;  %v795_v21 = vadd.f32 %v1605_v55, %v1603_v53  ;;  %v1607_v56 = vpop.eup %1606 }
 0x1a3   : > { %v1609_v9 = vpop.eup %1608 }
 0x1a4   : > { %1610 = vrcp.f32 %v798_v7  ;;  %v797_v57 = vadd.f32 %v1607_v56, %v795_v21  ;;  %v760_v21 = vadd.f32 %v759_v63, %v1964_v1 }
 0x1a6   : > { %v799_v60 = vadd.f32 %v1609_v9, %v797_v57 }
 0x1a8   : > { %1612 = vrcp.f32 %v799_v60 }
 0x1a9   : > { %1614 = vrcp.f32 %v1998_v38 }
 0x1aa   : > { %1616 = vrcp.f32 %v2004_v43 }
 0x1b1   : > { %v1611_v3 = vpop.eup %1610 }
 0x1b2   : > { %v804_v10 = vmul.f32 %v1611_v3, %v1597_v49  ;;  %v802_v18 = vmul.f32 %v1611_v3, %v1595_v47  ;;  %v806_v11 = vmul.f32 %v1611_v3, %v1599_v50 }
 0x1b4   : > { %v855_v39 = vmul.f32 %v804_v10, %v756_v23  ;;  %v850_v54 = vmul.f32 %v802_v18, %v756_v23  ;;  %v875_v61 = vmul.f32 %v804_v10, %v760_v21  ;;  %v870_v35 = vmul.f32 %v802_v18, %v760_v21 }
 0x1b5   : > { %v1613_v19 = vpop.eup %1612  ;;  %v880_v26 = vmul.f32 %v806_v11, %v760_v21  ;;  %v860_v1 = vmul.f32 %v806_v11, %v756_v23 }
 0x1b6   : > { %v805_v25 = vmul.f32 %v1613_v19, %v1605_v55  ;;  %v803_v28 = vmul.f32 %v1613_v19, %v1603_v53  ;;  %v807_v57 = vmul.f32 %v1613_v19, %v1607_v56  ;;  %v746_v56 = vadd.f32 %v745_v46, %v1966_v0 }
 0x1b7   : > { %v808_v46 = vmul.f32 %v1611_v3, %v2006_v52 }
 0x1b8   : > { %v856_v51 = vmul.f32 %v805_v25, %v758_v24  ;;  %v851_v7 = vmul.f32 %v803_v28, %v758_v24  ;;  %v876_v49 = vmul.f32 %v805_v25, %v762_v37  ;;  %v871_v47 = vmul.f32 %v803_v28, %v762_v37 }
 0x1b9   : > { %v881_v62 = vmul.f32 %v807_v57, %v762_v37  ;;  %v861_v4 = vmul.f32 %v807_v57, %v758_v24  ;;  %v815_v50 = vmul.f32 %v804_v10, %v746_v56 }
 0x1ba   : > { %v857_v60 = vadd.f32 %v856_v51, %v855_v39  ;;  %v852_v34 = vadd.f32 %v851_v7, %v850_v54  ;;  %v877_v55 = vadd.f32 %v876_v49, %v875_v61  ;;  %v872_v53 = vadd.f32 %v871_v47, %v870_v35 }
 0x1bb   : > { %v882_v63 = vadd.f32 %v881_v62, %v880_v26  ;;  %v862_v39 = vadd.f32 %v861_v4, %v860_v1  ;;  %v816_v51 = vmul.f32 %v805_v25, %v748_v27  ;;  %v811_v54 = vmul.f32 %v803_v28, %v748_v27 }
 0x1bc   : > { %858 = vadd.xlane.f32.xlu0 %v857_v60  ;;  %853 = vadd.xlane.f32.xlu1 %v852_v34  ;;  %v752_v34 = vadd.f32 %v751_v8, %v1968_v15  ;;  %v810_v35 = vmul.f32 %v802_v18, %v746_v56  ;;  %v750_v7 = vadd.f32 %v749_v20, %v1968_v15 }
 0x1bd   : > { %v809_v60 = vmul.f32 %v1613_v19, %v1609_v9  ;;  %v817_v48 = vadd.f32 %v816_v51, %v815_v50  ;;  %v885_v4 = vmul.f32 %v808_v46, %v760_v21  ;;  %v865_v1 = vmul.f32 %v808_v46, %v756_v23 }
 0x1be   : > { %v812_v49 = vadd.f32 %v811_v54, %v810_v35  ;;  %v836_v47 = vmul.f32 %v805_v25, %v752_v34  ;;  %v831_v61 = vmul.f32 %v803_v28, %v752_v34  ;;  %v835_v0 = vmul.f32 %v804_v10, %v750_v7 }
 0x1bf   : > { %v830_v26 = vmul.f32 %v802_v18, %v750_v7  ;;  %v886_v8 = vmul.f32 %v809_v60, %v762_v37  ;;  %v866_v62 = vmul.f32 %v809_v60, %v758_v24  ;;  %v841_v9 = vmul.f32 %v807_v57, %v752_v34 }
 0x1c0   : > { %878 = vadd.xlane.f32.xlu1 %v877_v55  ;;  %873 = vadd.xlane.f32.xlu0 %v872_v53  ;;  %v837_v55 = vadd.f32 %v836_v47, %v835_v0  ;;  %v821_v19 = vmul.f32 %v807_v57, %v748_v27  ;;  %v840_v25 = vmul.f32 %v806_v11, %v750_v7 }
 0x1c1   : > { %v832_v53 = vadd.f32 %v831_v61, %v830_v26  ;;  %v887_v15 = vadd.f32 %v886_v8, %v885_v4  ;;  %v867_v20 = vadd.f32 %v866_v62, %v865_v1  ;;  %v820_v28 = vmul.f32 %v806_v11, %v746_v56 }
 0x1c2   : > { %v842_v10 = vadd.f32 %v841_v9, %v840_v25  ;;  %v826_v52 = vmul.f32 %v809_v60, %v748_v27  ;;  %v845_v3 = vmul.f32 %v808_v46, %v750_v7  ;;  %v825_v24 = vmul.f32 %v808_v46, %v746_v56 }
 0x1c3   : > { %v822_v18 = vadd.f32 %v821_v19, %v820_v28 }
 0x1c4   : > { %883 = vadd.xlane.f32.xlu1 %v882_v63  ;;  %863 = vadd.xlane.f32.xlu0 %v862_v39  ;;  %v846_v63 = vmul.f32 %v809_v60, %v752_v34  ;;  %v827_v39 = vadd.f32 %v826_v52, %v825_v24 }
 0x1c6   : > { %v847_v37 = vadd.f32 %v846_v63, %v845_v3 }
 0x1c8   : > { %818 = vadd.xlane.f32.xlu1 %v817_v48  ;;  %813 = vadd.xlane.f32.xlu0 %v812_v49 }
 0x1cc   : > { %838 = vadd.xlane.f32.xlu1 %v837_v55  ;;  %833 = vadd.xlane.f32.xlu0 %v832_v53 }
 0x1d0   : > { %888 = vadd.xlane.f32.xlu1 %v887_v15  ;;  %868 = vadd.xlane.f32.xlu0 %v867_v20 }
 0x1d4   : > { %843 = vadd.xlane.f32.xlu1 %v842_v10  ;;  %823 = vadd.xlane.f32.xlu0 %v822_v18 }
 0x1d8   : > { %848 = vadd.xlane.f32.xlu1 %v847_v37  ;;  %828 = vadd.xlane.f32.xlu0 %v827_v39 }
 0x245   : > { %v854_v23 = vpop.xlane.xlu1 %853  ;;  %v859_v21 = vpop.xlane.xlu0 %858 }
 0x246   : > { %v960_v57 = vmul.f32 %v1978_v58, %v854_v23  ;;  %v961_v51 = vmul.f32 %v1986_v6, %v854_v23  ;;  %v962_v11 = vmul.f32 %v1980_v59, %v859_v21  ;;  %v963_v54 = vmul.f32 %v1988_v2, %v859_v21 }
 0x248   : > { %v964_v34 = vadd.f32 %v962_v11, %v960_v57  ;;  %v965_v27 = vadd.f32 %v963_v54, %v961_v51  ;;  %v1615_v57 = vpop.eup %1614 }
 0x249   : > { %v879_v50 = vpop.xlane.xlu1 %878  ;;  %v874_v35 = vpop.xlane.xlu0 %873 }
 0x24a   : > { %v978_v56 = vmul.f32 %v1980_v59, %v879_v50  ;;  %v979_v7 = vmul.f32 %v1988_v2, %v879_v50  ;;  %v976_v60 = vmul.f32 %v1978_v58, %v874_v35  ;;  %v977_v48 = vmul.f32 %v1986_v6, %v874_v35 }
 0x24c   : > { %v980_v49 = vadd.f32 %v978_v56, %v976_v60  ;;  %v981_v47 = vadd.f32 %v979_v7, %v977_v48 }
 0x24d   : > { %v884_v61 = vpop.xlane.xlu1 %883  ;;  %v864_v0 = vpop.xlane.xlu0 %863 }
 0x24e   : > { %v982_v26 = vmul.f32 %v1982_v5, %v884_v61  ;;  %v983_v46 = vmul.f32 %v1995_v36, %v884_v61  ;;  %v966_v55 = vmul.f32 %v1982_v5, %v864_v0  ;;  %v967_v53 = vmul.f32 %v1995_v36, %v864_v0 }
 0x250   : > { %v984_v8 = vadd.f32 %v982_v26, %v980_v49  ;;  %v985_v62 = vadd.f32 %v983_v46, %v981_v47  ;;  %v968_v4 = vadd.f32 %v966_v55, %v964_v34  ;;  %v969_v1 = vadd.f32 %v967_v53, %v965_v27 }
 0x251   : > { %v819_v15 = vpop.xlane.xlu1 %818  ;;  %v814_v20 = vpop.xlane.xlu0 %813 }
 0x252   : > { %v930_v9 = vmul.f32 %v1980_v59, %v819_v15  ;;  %v931_v38 = vmul.f32 %v1988_v2, %v819_v15  ;;  %v928_v19 = vmul.f32 %v1978_v58, %v814_v20  ;;  %v929_v25 = vmul.f32 %v1986_v6, %v814_v20 }
 0x254   : > { %v932_v28 = vadd.f32 %v930_v9, %v928_v19  ;;  %v933_v10 = vadd.f32 %v931_v38, %v929_v25 }
 0x255   : > { %v839_v18 = vpop.xlane.xlu1 %838  ;;  %v834_v63 = vpop.xlane.xlu0 %833 }
 0x256   : > { %v946_v43 = vmul.f32 %v1980_v59, %v839_v18  ;;  %v947_v52 = vmul.f32 %v1988_v2, %v839_v18  ;;  %v944_v3 = vmul.f32 %v1978_v58, %v834_v63  ;;  %v945_v24 = vmul.f32 %v1986_v6, %v834_v63  ;;  %v1617_v59 = vpop.eup %1616 }
 0x258   : > { %v948_v37 = vadd.f32 %v946_v43, %v944_v3  ;;  %v949_v39 = vadd.f32 %v947_v52, %v945_v24  ;;  %v331_v52 = vld [vmem:[%s2432_s3] sm:$0x3f] }
 0x259   : > { %v889_v23 = vpop.xlane.xlu1 %888  ;;  %v869_v21 = vpop.xlane.xlu0 %868  ;;  %v1290_v24 = vcombine.high %v331_v52, %v331_v52 }
 0x25a   : > { %v986_v51 = vmul.f32 %v1991_v31, %v889_v23  ;;  %v987_v11 = vmul.f32 %v2001_v42, %v889_v23  ;;  %v970_v54 = vmul.f32 %v1991_v31, %v869_v21  ;;  %v971_v34 = vmul.f32 %v2001_v42, %v869_v21 }
 0x25c   : > { %v988_v27 = vadd.f32 %v986_v51, %v984_v8  ;;  %v989_v2 = vadd.f32 %v987_v11, %v985_v62  ;;  %v972_v50 = vadd.f32 %v970_v54, %v968_v4  ;;  %v973_v58 = vadd.f32 %v971_v34, %v969_v1 }
 0x25d   : > { %v844_v35 = vpop.xlane.xlu1 %843  ;;  %v824_v6 = vpop.xlane.xlu0 %823 }
 0x25e   : > { %v2044_v56 = vmul.f32 %v1615_v57, %v988_v27  ;;  %v2046_v7 = vmul.f32 %v1617_v59, %v989_v2  ;;  %v2048_v60 = vmul.f32 %v1615_v57, %v972_v50  ;;  %v2050_v48 = vmul.f32 %v1617_v59, %v973_v58 }
 0x25f   : > { %v950_v49 = vmul.f32 %v1982_v5, %v844_v35  ;;  %v951_v47 = vmul.f32 %v1995_v36, %v844_v35  ;;  %v934_v61 = vmul.f32 %v1982_v5, %v824_v6  ;;  %v935_v0 = vmul.f32 %v1995_v36, %v824_v6 }
 0x260   : > { %1094 = vrot.lane.b32.xlu1 %v2044_v56, %s1633_s16  ;;  %1092 = vrot.lane.b32.xlu0 %v2048_v60, %s1633_s16 }
 0x261   : > { %v952_v26 = vadd.f32 %v950_v49, %v948_v37  ;;  %v953_v46 = vadd.f32 %v951_v47, %v949_v39  ;;  %v936_v55 = vadd.f32 %v934_v61, %v932_v28  ;;  %v937_v53 = vadd.f32 %v935_v0, %v933_v10  ;;  %v849_v8 = vpop.xlane.xlu1 %848  ;;  %v829_v62 = vpop.xlane.xlu0 %828  ;;  %v332_v49 = vld [vmem:[%s2433_s4] sm:$0xf] }
 0x262   : > { %v954_v4 = vmul.f32 %v1991_v31, %v849_v8  ;;  %v955_v1 = vmul.f32 %v2001_v42, %v849_v8  ;;  %v938_v5 = vmul.f32 %v1991_v31, %v829_v62  ;;  %v939_v36 = vmul.f32 %v2001_v42, %v829_v62 }
 0x263   : > { %v1637_v31 = vmov 1983009808  }
 0x264   : > { %v956_v15 = vadd.f32 %v954_v4, %v952_v26  ;;  %v957_v20 = vadd.f32 %v955_v1, %v953_v46  ;;  %v940_v9 = vadd.f32 %v938_v5, %v936_v55  ;;  %v941_v38 = vadd.f32 %v939_v36, %v937_v53  ;;  %1100 = vrot.lane.b32.xlu1 %v2050_v48, %s1633_s16 }
 0x265   : > { %1102 = vrot.lane.b32.xlu0 %v2046_v7, %s1633_s16  ;;  %v1292_v42 = vunpack.c.l.s4 %v1637_v31 }
 0x266   : > { %v2068_v19 = vmul.f32 %v1615_v57, %v956_v15  ;;  %v2070_v25 = vmul.f32 %v1617_v59, %v957_v20  ;;  %v2072_v28 = vmul.f32 %v1615_v57, %v940_v9  ;;  %v2074_v10 = vmul.f32 %v1617_v59, %v941_v38 }
 0x267   : > { %v1293_v18 = vunpack.c.0.s8 %v1292_v42 }
 0x268   : > { %1088 = vrot.lane.b32.xlu1 %v2072_v28, %s1633_s16 }
 0x269   : > { %1090 = vrot.lane.b32.xlu0 %v2068_v19, %s1633_s16  ;;  %v1296_v3 = vsub.s32 %v1293_v18, %v1776_v16 }
 0x26b   : > { %v2192_v37 = vrot.slane %v331_v52, %v1296_v3  ;;  %v2194_v23 = vrot.slane %v1290_v24, %v1296_v3 }
 0x26c   : > { %1096 = vrot.lane.b32.xlu1 %v2074_v10, %s1633_s16 }
 0x26d   : > { %1098 = vrot.lane.b32.xlu0 %v2070_v25, %s1633_s16  ;;  %v1305_v16 = vcombine.high %v2192_v37, %v2192_v37 }
 0x26f   : > { %1344 = vmatprep.mubr.bf16.mxu1 %v1305_v16 }
 0x270   : > { %1060 = vrot.lane.b32.xlu1 %v2048_v60, %s1636_s18 }
 0x271   : > { %1062 = vrot.lane.b32.xlu0 %v2044_v56, %s1636_s18 }
 0x274   : > { %1068 = vrot.lane.b32.xlu1 %v2050_v48, %s1636_s18 }
 0x275   : > { %1070 = vrot.lane.b32.xlu0 %v2046_v7, %s1636_s18 }
 0x278   : > { %1056 = vrot.lane.b32.xlu1 %v2072_v28, %s1636_s18 }
 0x279   : > { %1058 = vrot.lane.b32.xlu0 %v2068_v19, %s1636_s18 }
 0x27c   : > { %1064 = vrot.lane.b32.xlu1 %v2074_v10, %s1636_s18 }
 0x27d   : > { %1066 = vrot.lane.b32.xlu0 %v2070_v25, %s1636_s18 }
 0x280   : > { %1028 = vrot.lane.b32.xlu1 %v2048_v60, %s1632_s15 }
 0x281   : > { %1030 = vrot.lane.b32.xlu0 %v2044_v56, %s1632_s15 }
 0x284   : > { %1036 = vrot.lane.b32.xlu1 %v2050_v48, %s1632_s15 }
 0x285   : > { %1038 = vrot.lane.b32.xlu0 %v2046_v7, %s1632_s15 }
 0x288   : > { %1024 = vrot.lane.b32.xlu1 %v2072_v28, %s1632_s15 }
 0x289   : > { %1026 = vrot.lane.b32.xlu0 %v2068_v19, %s1632_s15 }
 0x28c   : > { %1032 = vrot.lane.b32.xlu1 %v2074_v10, %s1632_s15 }
 0x28d   : > { %1034 = vrot.lane.b32.xlu0 %v2070_v25, %s1632_s15 }
 0x290   : > { %996 = vrot.lane.b32.xlu1 %v2048_v60, %s1635_s17 }
 0x291   : > { %998 = vrot.lane.b32.xlu0 %v2044_v56, %s1635_s17 }
 0x294   : > { %1004 = vrot.lane.b32.xlu1 %v2050_v48, %s1635_s17 }
 0x295   : > { %1006 = vrot.lane.b32.xlu0 %v2046_v7, %s1635_s17 }
 0x298   : > { %992 = vrot.lane.b32.xlu1 %v2072_v28, %s1635_s17 }
 0x299   : > { %994 = vrot.lane.b32.xlu0 %v2068_v19, %s1635_s17 }
 0x29c   : > { %1000 = vrot.lane.b32.xlu1 %v2074_v10, %s1635_s17 }
 0x29d   : > { %1002 = vrot.lane.b32.xlu0 %v2070_v25, %s1635_s17 }
 0x2a0   : > { %1188 = vrot.lane.b32.xlu1 %v2048_v60, %s1630_s13 }
 0x2a1   : > { %1190 = vrot.lane.b32.xlu0 %v2044_v56, %s1630_s13 }
 0x2a4   : > { %1196 = vrot.lane.b32.xlu1 %v2050_v48, %s1630_s13 }
 0x2a5   : > { %1198 = vrot.lane.b32.xlu0 %v2046_v7, %s1630_s13 }
 0x2a8   : > { %1184 = vrot.lane.b32.xlu1 %v2072_v28, %s1630_s13 }
 0x2a9   : > { %1186 = vrot.lane.b32.xlu0 %v2068_v19, %s1630_s13 }
 0x2ac   : > { %1192 = vrot.lane.b32.xlu1 %v2074_v10, %s1630_s13 }
 0x2ad   : > { %1194 = vrot.lane.b32.xlu0 %v2070_v25, %s1630_s13 }
 0x2b0   : > { %1156 = vrot.lane.b32.xlu1 %v2048_v60, %s1631_s14 }
 0x2b1   : > { %1158 = vrot.lane.b32.xlu0 %v2044_v56, %s1631_s14 }
 0x2b4   : > { %1164 = vrot.lane.b32.xlu1 %v2050_v48, %s1631_s14 }
 0x2b5   : > { %1166 = vrot.lane.b32.xlu0 %v2046_v7, %s1631_s14 }
 0x2b8   : > { %1152 = vrot.lane.b32.xlu1 %v2072_v28, %s1631_s14 }
 0x2b9   : > { %1154 = vrot.lane.b32.xlu0 %v2068_v19, %s1631_s14 }
 0x2bc   : > { %1160 = vrot.lane.b32.xlu1 %v2074_v10, %s1631_s14 }
 0x2bd   : > { %1162 = vrot.lane.b32.xlu0 %v2070_v25, %s1631_s14 }
 0x2c0   : > { %1124 = vrot.lane.b32.xlu1 %v2048_v60, %s1628_s11 }
 0x2c1   : > { %1126 = vrot.lane.b32.xlu0 %v2044_v56, %s1628_s11 }
 0x2c4   : > { %1132 = vrot.lane.b32.xlu1 %v2050_v48, %s1628_s11 }
 0x2c5   : > { %1134 = vrot.lane.b32.xlu0 %v2046_v7, %s1628_s11 }
 0x2c8   : > { %1120 = vrot.lane.b32.xlu1 %v2072_v28, %s1628_s11 }
 0x2c9   : > { %1122 = vrot.lane.b32.xlu0 %v2068_v19, %s1628_s11 }
 0x2cc   : > { %1128 = vrot.lane.b32.xlu1 %v2074_v10, %s1628_s11 }
 0x2cd   : > { %1130 = vrot.lane.b32.xlu0 %v2070_v25, %s1628_s11 }
 0x2d0   : > { %1220 = vrot.lane.b32.xlu1 %v2048_v60, %s1629_s12 }
 0x2d1   : > { %1222 = vrot.lane.b32.xlu0 %v2044_v56, %s1629_s12 }
 0x2d2   : > { %v1095_v63 = vpop.permute.xlu1 %1094  ;;  %v1093_v43 = vpop.permute.xlu0 %1092 }
 0x2d4   : > { %1228 = vrot.lane.b32.xlu1 %v2050_v48, %s1629_s12 }
 0x2d5   : > { %1230 = vrot.lane.b32.xlu0 %v2046_v7, %s1629_s12 }
 0x2d6   : > { %v1101_v39 = vpop.permute.xlu1 %1100 }
 0x2d7   : > { %v1106_v21 = vsel %vm410_vm7, %v1093_v43, %v1101_v39  ;;  %v1110_v57 = vsel %vm410_vm7, %v1101_v39, %v1093_v43  ;;  %v1103_v51 = vpop.permute.xlu0 %1102 }
 0x2d8   : > { %v1116_v11 = vmul.f32 %v1110_v57, %v1871_v14  ;;  %v1107_v54 = vsel %vm410_vm7, %v1095_v63, %v1103_v51  ;;  %v1111_v34 = vsel %vm410_vm7, %v1103_v51, %v1095_v63  ;;  %1216 = vrot.lane.b32.xlu1 %v2072_v28, %s1629_s12  ;;  %v1117_v59 = vmul.f32 %v1106_v21, %v1881_v22 }
 0x2d9   : > { %v1118_v27 = vmul.f32 %v1111_v34, %v1871_v14  ;;  %1218 = vrot.lane.b32.xlu0 %v2068_v19, %s1629_s12  ;;  %v1119_v2 = vmul.f32 %v1107_v54, %v1881_v22 }
 0x2da   : > { %v1089_v50 = vpop.permute.xlu1 %1088 }
 0x2db   : > { %v1091_v58 = vpop.permute.xlu0 %1090  ;;  %v1263_v35 = vpack.c.bf16 %v1119_v2, %v1117_v59  ;;  %v1262_v6 = vpack.c.bf16 %v1118_v27, %v1116_v11 }
 0x2dc   : > { %1224 = vrot.lane.b32.xlu1 %v2074_v10, %s1629_s12 }
 0x2dd   : > { %1226 = vrot.lane.b32.xlu0 %v2070_v25, %s1629_s12  ;;  %1312 = vmatprep.subr.bf16.mxu1 %v1263_v35 }
 0x2de   : > { %1313 = vmatpush1.bf16.msra.mxu1 %v1262_v6  ;;  %v1097_v47 = vpop.permute.xlu1 %1096 }
 0x2df   : > { %v1104_v61 = vsel %vm410_vm7, %v1089_v50, %v1097_v47  ;;  %v1108_v0 = vsel %vm410_vm7, %v1097_v47, %v1089_v50  ;;  %v1099_v26 = vpop.permute.xlu0 %1098 }
 0x2e0   : > { %v1112_v46 = vmul.f32 %v1108_v0, %v1871_v14  ;;  %v1113_v55 = vmul.f32 %v1104_v61, %v1881_v22  ;;  %v1105_v53 = vsel %vm410_vm7, %v1091_v58, %v1099_v26  ;;  %v1109_v8 = vsel %vm410_vm7, %v1099_v26, %v1091_v58  ;;  %1286 = vperm.xlu1 %1569, %v332_v49  }
 0x2e1   : > { %v1114_v62 = vmul.f32 %v1109_v8, %v1871_v14  ;;  %v1115_v4 = vmul.f32 %v1105_v53, %v1881_v22 }
 0x2e2   : > { %v1061_v1 = vpop.permute.xlu1 %1060 }
 0x2e3   : > { %v1063_v5 = vpop.permute.xlu0 %1062  ;;  %v1261_v36 = vpack.c.bf16 %v1115_v4, %v1113_v55  ;;  %v1260_v15 = vpack.c.bf16 %v1114_v62, %v1112_v46 }
 0x2e5   : > { %1314 = vmatprep.subr.bf16.mxu1 %v1261_v36 }
 0x2e6   : > { %1315 = vmatpush1.bf16.msra.mxu1 %v1260_v15  ;;  %v1069_v20 = vpop.permute.xlu1 %1068 }
 0x2e7   : > { %v1074_v9 = vsel %vm388_vm9, %v1061_v1, %v1069_v20  ;;  %v1078_v38 = vsel %vm388_vm9, %v1069_v20, %v1061_v1  ;;  %v1071_v31 = vpop.permute.xlu0 %1070 }
 0x2e8   : > { %v1084_v42 = vmul.f32 %v1078_v38, %v1907_v44  ;;  %v1085_v14 = vmul.f32 %v1074_v9, %v1910_v45  ;;  %v1075_v22 = vsel %vm388_vm9, %v1063_v5, %v1071_v31  ;;  %v1079_v18 = vsel %vm388_vm9, %v1071_v31, %v1063_v5 }
 0x2e9   : > { %v1086_v63 = vmul.f32 %v1079_v18, %v1907_v44  ;;  %v1087_v43 = vmul.f32 %v1075_v22, %v1910_v45 }
 0x2ea   : > { %v1057_v52 = vpop.permute.xlu1 %1056 }
 0x2eb   : > { %v1059_v3 = vpop.permute.xlu0 %1058  ;;  %v1259_v24 = vpack.c.bf16 %v1087_v43, %v1085_v14  ;;  %v1258_v39 = vpack.c.bf16 %v1086_v63, %v1084_v42 }
 0x2ed   : > { %1316 = vmatprep.subr.bf16.mxu1 %v1259_v24 }
 0x2ee   : > { %1317 = vmatpush1.bf16.msra.mxu1 %v1258_v39  ;;  %v1065_v21 = vpop.permute.xlu1 %1064 }
 0x2ef   : > { %v1072_v57 = vsel %vm388_vm9, %v1057_v52, %v1065_v21  ;;  %v1076_v51 = vsel %vm388_vm9, %v1065_v21, %v1057_v52  ;;  %v1067_v16 = vpop.permute.xlu0 %1066 }
 0x2f0   : > { %v1080_v11 = vmul.f32 %v1076_v51, %v1907_v44  ;;  %v1081_v54 = vmul.f32 %v1072_v57, %v1910_v45  ;;  %v1073_v34 = vsel %vm388_vm9, %v1059_v3, %v1067_v16  ;;  %v1077_v59 = vsel %vm388_vm9, %v1067_v16, %v1059_v3 }
 0x2f1   : > { %v1082_v27 = vmul.f32 %v1077_v59, %v1907_v44  ;;  %v1083_v2 = vmul.f32 %v1073_v34, %v1910_v45 }
 0x2f2   : > { %v1029_v50 = vpop.permute.xlu1 %1028 }
 0x2f3   : > { %v1031_v58 = vpop.permute.xlu0 %1030  ;;  %v1257_v35 = vpack.c.bf16 %v1083_v2, %v1081_v54  ;;  %v1256_v6 = vpack.c.bf16 %v1082_v27, %v1080_v11 }
 0x2f5   : > { %1318 = vmatprep.subr.bf16.mxu1 %v1257_v35 }
 0x2f6   : > { %1319 = vmatpush1.bf16.msra.mxu1 %v1256_v6  ;;  %v1037_v49 = vpop.permute.xlu1 %1036 }
 0x2f7   : > { %v1042_v47 = vsel %vm366_vm6, %v1029_v50, %v1037_v49  ;;  %v1046_v61 = vsel %vm366_vm6, %v1037_v49, %v1029_v50  ;;  %v1039_v0 = vpop.permute.xlu0 %1038 }
 0x2f8   : > { %v1052_v26 = vmul.f32 %v1046_v61, %v1865_v12  ;;  %v1053_v44 = vmul.f32 %v1042_v47, %v1868_v13  ;;  %v1043_v45 = vsel %vm366_vm6, %v1031_v58, %v1039_v0  ;;  %v1047_v46 = vsel %vm366_vm6, %v1039_v0, %v1031_v58 }
 0x2f9   : > { %v1054_v55 = vmul.f32 %v1047_v46, %v1865_v12  ;;  %v1055_v53 = vmul.f32 %v1043_v45, %v1868_v13 }
 0x2fa   : > { %v1025_v8 = vpop.permute.xlu1 %1024 }
 0x2fb   : > { %v1027_v62 = vpop.permute.xlu0 %1026  ;;  %v1255_v4 = vpack.c.bf16 %v1055_v53, %v1053_v44  ;;  %v1254_v1 = vpack.c.bf16 %v1054_v55, %v1052_v26 }
 0x2fd   : > { %1320 = vmatprep.subr.bf16.mxu1 %v1255_v4 }
 0x2fe   : > { %1321 = vmatpush1.bf16.msra.mxu1 %v1254_v1  ;;  %v1033_v5 = vpop.permute.xlu1 %1032 }
 0x2ff   : > { %v1040_v36 = vsel %vm366_vm6, %v1025_v8, %v1033_v5  ;;  %v1044_v15 = vsel %vm366_vm6, %v1033_v5, %v1025_v8  ;;  %v1035_v20 = vpop.permute.xlu0 %1034 }
 0x300   : > { %v1048_v9 = vmul.f32 %v1044_v15, %v1865_v12  ;;  %v1049_v38 = vmul.f32 %v1040_v36, %v1868_v13  ;;  %v1041_v31 = vsel %vm366_vm6, %v1027_v62, %v1035_v20  ;;  %v1045_v42 = vsel %vm366_vm6, %v1035_v20, %v1027_v62 }
 0x301   : > { %v1050_v14 = vmul.f32 %v1045_v42, %v1865_v12  ;;  %v1051_v22 = vmul.f32 %v1041_v31, %v1868_v13 }
 0x302   : > { %v997_v18 = vpop.permute.xlu1 %996 }
 0x303   : > { %v999_v63 = vpop.permute.xlu0 %998  ;;  %v1253_v43 = vpack.c.bf16 %v1051_v22, %v1049_v38  ;;  %v1252_v52 = vpack.c.bf16 %v1050_v14, %v1048_v9 }
 0x305   : > { %1322 = vmatprep.subr.bf16.mxu1 %v1253_v43 }
 0x306   : > { %1323 = vmatpush1.bf16.msra.mxu1 %v1252_v52  ;;  %v1005_v3 = vpop.permute.xlu1 %1004 }
 0x307   : > { %v1010_v24 = vsel %vm345_vm8, %v997_v18, %v1005_v3  ;;  %v1014_v39 = vsel %vm345_vm8, %v1005_v3, %v997_v18  ;;  %v1007_v21 = vpop.permute.xlu0 %1006 }
 0x308   : > { %v1020_v57 = vmul.f32 %v1014_v39, %v1892_v29  ;;  %v1021_v12 = vmul.f32 %v1010_v24, %v1895_v30  ;;  %v1011_v13 = vsel %vm345_vm8, %v999_v63, %v1007_v21  ;;  %v1015_v51 = vsel %vm345_vm8, %v1007_v21, %v999_v63 }
 0x309   : > { %v1022_v16 = vmul.f32 %v1015_v51, %v1892_v29  ;;  %v1023_v11 = vmul.f32 %v1011_v13, %v1895_v30 }
 0x30a   : > { %v993_v54 = vpop.permute.xlu1 %992 }
 0x30b   : > { %v995_v34 = vpop.permute.xlu0 %994  ;;  %v1251_v59 = vpack.c.bf16 %v1023_v11, %v1021_v12  ;;  %v1250_v27 = vpack.c.bf16 %v1022_v16, %v1020_v57 }
 0x30d   : > { %1324 = vmatprep.subr.bf16.mxu1 %v1251_v59 }
 0x30e   : > { %1325 = vmatpush1.bf16.msra.mxu1 %v1250_v27  ;;  %v1001_v2 = vpop.permute.xlu1 %1000 }
 0x30f   : > { %v1008_v50 = vsel %vm345_vm8, %v993_v54, %v1001_v2  ;;  %v1012_v58 = vsel %vm345_vm8, %v1001_v2, %v993_v54  ;;  %v1003_v35 = vpop.permute.xlu0 %1002 }
 0x310   : > { %v1016_v6 = vmul.f32 %v1012_v58, %v1892_v29  ;;  %v1017_v49 = vmul.f32 %v1008_v50, %v1895_v30  ;;  %v1009_v47 = vsel %vm345_vm8, %v995_v34, %v1003_v35  ;;  %v1013_v61 = vsel %vm345_vm8, %v1003_v35, %v995_v34 }
 0x311   : > { %v1018_v0 = vmul.f32 %v1013_v61, %v1892_v29  ;;  %v1019_v26 = vmul.f32 %v1009_v47, %v1895_v30 }
 0x312   : > { %v1189_v44 = vpop.permute.xlu1 %1188 }
 0x313   : > { %v1191_v45 = vpop.permute.xlu0 %1190  ;;  %v1249_v46 = vpack.c.bf16 %v1019_v26, %v1017_v49  ;;  %v1248_v55 = vpack.c.bf16 %v1018_v0, %v1016_v6 }
 0x315   : > { %1326 = vmatprep.subr.bf16.mxu1 %v1249_v46 }
 0x316   : > { %1327 = vmatpush1.bf16.msra.mxu1 %v1248_v55  ;;  %v1197_v53 = vpop.permute.xlu1 %1196 }
 0x317   : > { %v1202_v8 = vsel %vm476_vm1, %v1189_v44, %v1197_v53  ;;  %v1206_v62 = vsel %vm476_vm1, %v1197_v53, %v1189_v44  ;;  %v1199_v4 = vpop.permute.xlu0 %1198 }
 0x318   : > { %v1212_v1 = vmul.f32 %v1202_v8, %v1812_v32  ;;  %v1213_v29 = vmul.f32 %v1206_v62, %v1815_v33  ;;  %v1203_v30 = vsel %vm476_vm1, %v1191_v45, %v1199_v4  ;;  %v1207_v5 = vsel %vm476_vm1, %v1199_v4, %v1191_v45 }
 0x319   : > { %v1214_v36 = vmul.f32 %v1203_v30, %v1812_v32  ;;  %v1215_v15 = vmul.f32 %v1207_v5, %v1815_v33 }
 0x31a   : > { %v1185_v20 = vpop.permute.xlu1 %1184 }
 0x31b   : > { %v1187_v9 = vpop.permute.xlu0 %1186  ;;  %v1279_v38 = vpack.c.bf16 %v1215_v15, %v1213_v29  ;;  %v1278_v31 = vpack.c.bf16 %v1214_v36, %v1212_v1  ;;  %v2450_v15 = vld [vmem:[#allocation2_spill] sm:$0xff] }
 0x31d   : > { %1328 = vmatprep.subr.bf16.mxu1 %v1279_v38 }
 0x31e   : > { %1329 = vmatpush2.bf16.msra.mxu1 %v1278_v31  ;;  %v1193_v42 = vpop.permute.xlu1 %1192 }
 0x31f   : > { %v1200_v14 = vsel %vm476_vm1, %v1185_v20, %v1193_v42  ;;  %v1204_v22 = vsel %vm476_vm1, %v1193_v42, %v1185_v20  ;;  %v1195_v18 = vpop.permute.xlu0 %1194 }
 0x320   : > { %v1208_v63 = vmul.f32 %v1200_v14, %v1812_v32  ;;  %v1209_v43 = vmul.f32 %v1204_v22, %v1815_v33  ;;  %v1201_v52 = vsel %vm476_vm1, %v1187_v9, %v1195_v18  ;;  %v1205_v3 = vsel %vm476_vm1, %v1195_v18, %v1187_v9  ;;  %v2451_v9 = vld [vmem:[#allocation3_spill] sm:$0xff] }
 0x321   : > { %v1210_v24 = vmul.f32 %v1201_v52, %v1812_v32  ;;  %v1211_v39 = vmul.f32 %v1205_v3, %v1815_v33 }
 0x322   : > { %v1157_v21 = vpop.permute.xlu1 %1156 }
 0x323   : > { %v1159_v57 = vpop.permute.xlu0 %1158  ;;  %v1277_v12 = vpack.c.bf16 %v1211_v39, %v1209_v43  ;;  %v1276_v13 = vpack.c.bf16 %v1210_v24, %v1208_v63 }
 0x325   : > { %1330 = vmatprep.subr.bf16.mxu1 %v1277_v12 }
 0x326   : > { %1331 = vmatpush2.bf16.msra.mxu1 %v1276_v13  ;;  %v1165_v51 = vpop.permute.xlu1 %1164 }
 0x327   : > { %v1170_v16 = vsel %vm454_vm3, %v1157_v21, %v1165_v51  ;;  %v1174_v11 = vsel %vm454_vm3, %v1165_v51, %v1157_v21  ;;  %v1167_v54 = vpop.permute.xlu0 %1166 }
 0x328   : > { %v1180_v34 = vmul.f32 %v1170_v16, %v1827_v40  ;;  %v1181_v32 = vmul.f32 %v1174_v11, %v1830_v41  ;;  %v1171_v33 = vsel %vm454_vm3, %v1159_v57, %v1167_v54  ;;  %v1175_v59 = vsel %vm454_vm3, %v1167_v54, %v1159_v57 }
 0x329   : > { %v1182_v27 = vmul.f32 %v1171_v33, %v1827_v40  ;;  %v1183_v2 = vmul.f32 %v1175_v59, %v1830_v41 }
 0x32a   : > { %v1153_v50 = vpop.permute.xlu1 %1152 }
 0x32b   : > { %v1155_v58 = vpop.permute.xlu0 %1154  ;;  %v1275_v35 = vpack.c.bf16 %v1183_v2, %v1181_v32  ;;  %v1274_v6 = vpack.c.bf16 %v1182_v27, %v1180_v34  ;;  %v1267_v32 = vpack.c.bf16 %v2046_v7, %v2050_v48 }
 0x32d   : > { %1332 = vmatprep.subr.bf16.mxu1 %v1275_v35 }
 0x32e   : > { %1333 = vmatpush2.bf16.msra.mxu1 %v1274_v6  ;;  %v1161_v49 = vpop.permute.xlu1 %1160  ;;  %v2453_v6 = vld [vmem:[#allocation4_spill] sm:$0xff] }
 0x32f   : > { %v1168_v47 = vsel %vm454_vm3, %v1153_v50, %v1161_v49  ;;  %v1172_v61 = vsel %vm454_vm3, %v1161_v49, %v1153_v50  ;;  %v1163_v0 = vpop.permute.xlu0 %1162  ;;  %v1266_v50 = vpack.c.bf16 %v2044_v56, %v2048_v60 }
 0x330   : > { %v1176_v26 = vmul.f32 %v1168_v47, %v1827_v40  ;;  %v1177_v44 = vmul.f32 %v1172_v61, %v1830_v41  ;;  %v1169_v45 = vsel %vm454_vm3, %v1155_v58, %v1163_v0  ;;  %v1173_v46 = vsel %vm454_vm3, %v1163_v0, %v1155_v58  ;;  %v2452_v58 = vld [vmem:[#allocation5_spill] sm:$0xff] }
 0x331   : > { %v1178_v55 = vmul.f32 %v1169_v45, %v1827_v40  ;;  %v1179_v53 = vmul.f32 %v1173_v46, %v1830_v41  ;;  %v1265_v0 = vpack.c.bf16 %v2070_v25, %v2074_v10  ;;  %v1264_v45 = vpack.c.bf16 %v2068_v19, %v2072_v28 }
 0x332   : > { %v1125_v8 = vpop.permute.xlu1 %1124 }
 0x333   : > { %v1127_v62 = vpop.permute.xlu0 %1126  ;;  %v1273_v4 = vpack.c.bf16 %v1179_v53, %v1177_v44  ;;  %v1272_v1 = vpack.c.bf16 %v1178_v55, %v1176_v26 }
 0x335   : > { %1334 = vmatprep.subr.bf16.mxu1 %v1273_v4 }
 0x336   : > { %1335 = vmatpush2.bf16.msra.mxu1 %v1272_v1  ;;  %v1133_v29 = vpop.permute.xlu1 %1132 }
 0x337   : > { %v1138_v30 = vsel %vm432_vm0, %v1125_v8, %v1133_v29  ;;  %v1142_v5 = vsel %vm432_vm0, %v1133_v29, %v1125_v8  ;;  %v1135_v36 = vpop.permute.xlu0 %1134 }
 0x338   : > { %v1148_v20 = vmul.f32 %v1138_v30, %v2450_v15  ;;  %v1149_v40 = vmul.f32 %v1142_v5, %v2451_v9  ;;  %v1139_v41 = vsel %vm432_vm0, %v1127_v62, %v1135_v36  ;;  %v1143_v38 = vsel %vm432_vm0, %v1135_v36, %v1127_v62 }
 0x339   : > { %v1150_v31 = vmul.f32 %v1139_v41, %v2450_v15  ;;  %v1151_v42 = vmul.f32 %v1143_v38, %v2451_v9 }
 0x33a   : > { %v1121_v14 = vpop.permute.xlu1 %1120 }
 0x33b   : > { %v1123_v22 = vpop.permute.xlu0 %1122  ;;  %v1271_v18 = vpack.c.bf16 %v1151_v42, %v1149_v40  ;;  %v1270_v63 = vpack.c.bf16 %v1150_v31, %v1148_v20 }
 0x33d   : > { %1336 = vmatprep.subr.bf16.mxu1 %v1271_v18 }
 0x33e   : > { %1337 = vmatpush2.bf16.msra.mxu1 %v1270_v63  ;;  %v1129_v43 = vpop.permute.xlu1 %1128 }
 0x33f   : > { %v1136_v52 = vsel %vm432_vm0, %v1121_v14, %v1129_v43  ;;  %v1140_v3 = vsel %vm432_vm0, %v1129_v43, %v1121_v14  ;;  %v1131_v24 = vpop.permute.xlu0 %1130 }
 0x340   : > { %v1144_v39 = vmul.f32 %v1136_v52, %v2450_v15  ;;  %v1145_v21 = vmul.f32 %v1140_v3, %v2451_v9  ;;  %v1137_v57 = vsel %vm432_vm0, %v1123_v22, %v1131_v24  ;;  %v1141_v12 = vsel %vm432_vm0, %v1131_v24, %v1123_v22 }
 0x341   : > { %v1146_v13 = vmul.f32 %v1137_v57, %v2450_v15  ;;  %v1147_v51 = vmul.f32 %v1141_v12, %v2451_v9 }
 0x342   : > { %v1221_v16 = vpop.permute.xlu1 %1220 }
 0x343   : > { %v1223_v11 = vpop.permute.xlu0 %1222  ;;  %v1269_v54 = vpack.c.bf16 %v1147_v51, %v1145_v21  ;;  %v1268_v34 = vpack.c.bf16 %v1146_v13, %v1144_v39 }
 0x345   : > { %1338 = vmatprep.subr.bf16.mxu1 %v1269_v54 }
 0x346   : > { %1339 = vmatpush2.bf16.msra.mxu1 %v1268_v34  ;;  %v1229_v33 = vpop.permute.xlu1 %1228 }
 0x347   : > { %v1234_v59 = vsel %vm498_vm2, %v1221_v16, %v1229_v33  ;;  %v1238_v27 = vsel %vm498_vm2, %v1229_v33, %v1221_v16  ;;  %1340 = vmatprep.subr.bf16.mxu1 %v1267_v32  ;;  %v1231_v2 = vpop.permute.xlu0 %1230  ;;  %v334_v32 = vld [vmem:[%s2435_s6] sm:$0xf] }
 0x348   : > { %v1244_v35 = vmul.f32 %v1234_v59, %v2452_v58  ;;  %v1245_v49 = vmul.f32 %v1238_v27, %v2453_v6  ;;  %v1235_v7 = vsel %vm498_vm2, %v1223_v11, %v1231_v2  ;;  %v1239_v48 = vsel %vm498_vm2, %v1231_v2, %v1223_v11 }
 0x349   : > { %v1246_v47 = vmul.f32 %v1235_v7, %v2452_v58  ;;  %v1247_v61 = vmul.f32 %v1239_v48, %v2453_v6 }
 0x34a   : > { %1341 = vmatpush2.bf16.msra.mxu1 %v1266_v50  ;;  %v1217_v26 = vpop.permute.xlu1 %1216 }
 0x34b   : > { %v1282_v56 = vpack.c.bf16 %v1246_v47, %v1244_v35  ;;  %1342 = vmatprep.subr.bf16.mxu1 %v1265_v0  ;;  %v1219_v60 = vpop.permute.xlu0 %1218  ;;  %v1283_v44 = vpack.c.bf16 %v1247_v61, %v1245_v49 }
 0x34d   : > { %1365 = vmatprep.subr.bf16.mxu0 %v1283_v44 }
 0x34e   : > { %1343 = vmatpush2.bf16.msra.mxu1 %v1264_v45  ;;  %1366 = vmatpush1.bf16.msra.mxu0 %v1282_v56  ;;  %v1225_v46 = vpop.permute.xlu1 %1224 }
 0x34f   : > { %v1232_v55 = vsel %vm498_vm2, %v1217_v26, %v1225_v46  ;;  %v1236_v53 = vsel %vm498_vm2, %v1225_v46, %v1217_v26  ;;  %v1227_v25 = vpop.permute.xlu0 %1226 }
 0x350   : > { %v1240_v10 = vmul.f32 %v1232_v55, %v2452_v58  ;;  %v1241_v8 = vmul.f32 %v1236_v53, %v2453_v6  ;;  %v1233_v62 = vsel %vm498_vm2, %v1219_v60, %v1227_v25  ;;  %v1237_v19 = vsel %vm498_vm2, %v1227_v25, %v1219_v60 }
 0x351   : > { %v1242_v28 = vmul.f32 %v1233_v62, %v2452_v58  ;;  %v1243_v4 = vmul.f32 %v1237_v19, %v2453_v6  ;;  %1345 = vmatmul.mubr.bf16.vlgmr.msra.gmra.mxu1 %v2192_v37 }
 0x353   : > { %v1280_v1 = vpack.c.bf16 %v1242_v28, %v1240_v10  ;;  %v1281_v29 = vpack.c.bf16 %v1243_v4, %v1241_v8 }
 0x355   : > { %1367 = vmatprep.subr.bf16.mxu0 %v1281_v29 }
 0x356   : > { %1368 = vmatpush1.bf16.msra.mxu0 %v1280_v1 }
 0x359   : > { %1539 = vmatmul.mubr.msk.bf16.vlgmr.msra.gmra.mxu0 %vm1308_vm11, %v2194_v23  ;;  %v333_v23 = vld [vmem:[%s2434_s5] sm:$0xf] }
 0x35b   : > { %v1287_v15 = vpop.permute.xlu1 %1286 }
 0x411   : > { %v1346_v30 = vpop.f32.mrf.mxu1 }
 0x412   : > { %v1347_v17 = vadd.f32 %v1346_v30, %v1287_v15 }
 0x413   : > { %v1348_v5 = vpop.f32.mrf.mxu1 }
 0x414   : > { %v1349_v40 = vadd.f32 %v1348_v5, %v1287_v15 }
 0x415   : > { %v1350_v36 = vpop.f32.mrf.mxu1 }
 0x417   : > { %v1351_v20 = vpop.f32.mrf.mxu1 }
 0x419   : > { %v1387_v9 = vpop.f32.mrf.mxu0 }
 0x41a   : > { %v1388_v41 = vadd.f32 %v1387_v9, %v1347_v17 }
 0x41b   : > { %v1389_v38 = vpop.f32.mrf.mxu0 }
 0x41c   : > { %v1390_v31 = vadd.f32 %v1389_v38, %v1349_v40  ;;  %v1394_v37 = vsel %vm540_vm5, %v1388_v41, 0.0 }
 0x41d   : > { %v1391_v42 = vpop.f32.mrf.mxu0 }
 0x41e   : > { %v1395_v14 = vsel %vm540_vm5, %v1390_v31, 0.0 }
 0x41f   : > { %v1396_v22 = vadd.f32 %v1395_v14, %v1394_v37  ;;  %v1392_v18 = vpop.f32.mrf.mxu0 }
 0x421   : > { %1397 = vadd.xlane.f32.xlu0 %v1396_v22 }
 0x437   : > { %1438 = vperm.xlu0 %1568, %v333_v23  }
 0x4aa   : > { %v1398_v63 = vpop.xlane.xlu0 %1397 }
 0x4ab   : > { %v1399_v43 = vrot.slane %v1398_v63, 4 }
 0x4ad   : > { %v1400_v52 = vadd.f32 %v1399_v43, %v1398_v63 }
 0x4af   : > { %v1401_v3 = vrot.slane %v1400_v52, 2 }
 0x4b1   : > { %v1402_v24 = vadd.f32 %v1401_v3, %v1400_v52 }
 0x4b2   : > { %v1439_v61 = vpop.permute.xlu0 %1438 }
 0x4b3   : > { %v1403_v39 = vrot.slane %v1402_v24, 1 }
 0x4b5   : > { %v1404_v21 = vadd.f32 %v1403_v39, %v1402_v24 }
 0x4b7   : > { %1544 = vpush %v1404_v21 }
 0x4e8   : > { %s1545_s17 = spop %1544 }
 0x4e9   : > { %s1408_s18 = smul.f32 0.0009765625, %s1545_s17 }
 0x4eb   : > { %v1409_v57 = vstv %s1408_s18 }
 0x4ec   : > { %v1410_v12 = vsub.f32 %v1388_v41, %v1409_v57  ;;  %v1411_v13 = vsub.f32 %v1390_v31, %v1409_v57 }
 0x4ee   : > { %v1412_v51 = vmul.f32 %v1410_v12, %v1410_v12  ;;  %v1413_v16 = vmul.f32 %v1411_v13, %v1411_v13 }
 0x4f0   : > { %v1414_v11 = vsel %vm540_vm5, %v1412_v51, 0.0  ;;  %v1415_v54 = vsel %vm540_vm5, %v1413_v16, 0.0 }
 0x4f1   : > { %v1416_v34 = vadd.f32 %v1415_v54, %v1414_v11 }
 0x4f3   : > { %1417 = vadd.xlane.f32.xlu1 %v1416_v34 }
 0x504   : > { %1445 = vperm.xlu1 %1569, %v334_v32  }
 0x57c   : > { %v1418_v33 = vpop.xlane.xlu1 %1417 }
 0x57d   : > { %v1419_v59 = vrot.slane %v1418_v33, 4 }
 0x57f   : > { %v1420_v27 = vadd.f32 %v1419_v59, %v1418_v33 }
 0x580   : > { %v1446_v56 = vpop.permute.xlu1 %1445 }
 0x581   : > { %v1421_v2 = vrot.slane %v1420_v27, 2 }
 0x583   : > { %v1422_v50 = vadd.f32 %v1421_v2, %v1420_v27 }
 0x585   : > { %v1423_v58 = vrot.slane %v1422_v50, 1 }
 0x587   : > { %v1424_v35 = vadd.f32 %v1423_v58, %v1422_v50 }
 0x589   : > { %1546 = vpush %v1424_v35 }
 0x5ba   : > { %s1547_s10 = spop %1546 }
 0x5bb   : > { %s1428_s19 = smul.f32 0.0009765625, %s1547_s10 }
 0x5bd   : > { %s1429_s20 = sadd.f32 1e-05, %s1428_s19 }
 0x5bf   : > { %v1430_v6 = vstv %s1429_s20 }
 0x5c0   : > { %1618 = vrsqrt.f32 %v1430_v6 }
 0x5cd   : > { %v1619_v49 = vpop.eup %1618 }
 0x5ce   : > { %1548 = vpush %v1619_v49 }
 0x5ff   : > { %s1549_s21 = spop %1548 }
 0x600   : > { %v1433_v7 = vstv %s1549_s21 }
 0x601   : > { %v1434_v48 = vmul.f32 %v1433_v7, %v1410_v12  ;;  %v1435_v47 = vmul.f32 %v1433_v7, %v1411_v13 }
 0x603   : > { %v1441_v0 = vmul.f32 %v1439_v61, %v1434_v48  ;;  %v1442_v26 = vmul.f32 %v1439_v61, %v1435_v47 }
 0x605   : > { %v1448_v60 = vadd.f32 %v1446_v56, %v1441_v0  ;;  %v1449_v44 = vadd.f32 %v1446_v56, %v1442_v26 }
 0x607   : > { %v1452_v45 = vcombine.low %v1448_v60, %v1449_v44 }
 0x609   : > { %1454 = vst [vmem:[%s305_s24] sm:$0xff] %v1452_v45 }
 0x60a PF: > { %s18_s27 = sadd.s32 1, %s1626_s27  }
 0x60b   : > { %p15_p4 = scmp.ge.s32.totalorder %s18_s27, 4  }
 0x60d   :  { %17 = sbr.rel (!%p15_p4) target bundleno = 1 (0x1), region = 89 }

</bundles_post_ra>
